<compile_context>
chip_gen: v7x
topology: tpu7x:2x2x1
jax: 0.10.0
libtpu: 0.0.40
codegen_flags: <defaults>
</compile_context>

<pallas_src>
import jax
import jax.numpy as jnp
import numpy as np
from jax.experimental import pallas as pl
from jax.experimental.pallas import tpu as pltpu


def decoder_kernel(last_pos_rel_ref, h0_ref, c0_ref,
                   w_sp_ref, b_sp_ref,
                   w_ih_ref, w_hh_ref, b_lstm_ref,
                   w_hp_ref, b_hp_ref,
                   w_fused_ref, b_fused_ref,
                   pred_ref, hfin_ref):
    """Entire decoder rollout in one kernel invocation (grid=(1,)).

    Shapes (already padded by the wrapper; Bp = batch padded to x8,
    Hp = h_dim padded to x128, E = embedding_dim, T = seq_len):
      last_pos_rel: (Bp, 2)         h0, c0: (Bp, Hp)
      w_sp: (2, E)     b_sp: (1, E)
      w_ih: (E, 4*Hp)  w_hh: (Hp, 4*Hp)  b_lstm: (1, 4*Hp)   gate order i,f,g,o
      w_hp: (Hp, 2)    b_hp: (1, 2)
      w_fused = w_hp @ w_sp : (Hp, E)    b_fused = b_hp @ w_sp + b_sp : (1, E)
      pred: (T, Bp, 2)                   hfin: (Bp, Hp)
    """
    hp = h0_ref.shape[1]
    seq_len = pred_ref.shape[0]

    # Load all weights once; the loop below is fully unrolled at trace time so
    # the scheduler keeps them register/VMEM resident across the rollout.
    w_ih = w_ih_ref[...]
    w_hh = w_hh_ref[...]
    b_lstm = b_lstm_ref[...]
    w_hp = w_hp_ref[...]
    b_hp = b_hp_ref[...]
    w_fused = w_fused_ref[...]
    b_fused = b_fused_ref[...]

    # decoder_input = spatial_embedding(last_pos_rel)
    x = (jnp.dot(last_pos_rel_ref[...], w_sp_ref[...],
                 preferred_element_type=jnp.float32) + b_sp_ref[...])
    h = h0_ref[...]
    c = c0_ref[...]

    # Fully-unrolled in-kernel time loop (equivalent to
    # lax.fori_loop(0, seq_len, ..., unroll=True); seq_len is static and small,
    # and static indices make the per-step prediction store a static store).
    for t in range(seq_len):
        # LSTM cell, PyTorch gate order (i, f, g, o).  Gate blocks are padded
        # to Hp lanes each, so every slice below is a 128-lane-aligned tile.
        gates = (jnp.dot(x, w_ih, preferred_element_type=jnp.float32)
                 + jnp.dot(h, w_hh, preferred_element_type=jnp.float32)
                 + b_lstm)
        i_g = jax.nn.sigmoid(gates[:, 0 * hp:1 * hp])
        f_g = jax.nn.sigmoid(gates[:, 1 * hp:2 * hp])
        g_g = jnp.tanh(gates[:, 2 * hp:3 * hp])
        o_g = jax.nn.sigmoid(gates[:, 3 * hp:4 * hp])
        c = f_g * c + i_g * g_g
        h = o_g * jnp.tanh(c)

        # rel_pos = hidden2pos(output): only feeds the prediction writeback,
        # off the serial h -> x dependency chain.
        rel = jnp.dot(h, w_hp, preferred_element_type=jnp.float32) + b_hp
        pred_ref[t] = rel

        # Fused hidden2pos -> spatial_embedding for the next decoder input;
        # skipped on the last step (dead work).
        if t + 1 < seq_len:
            x = jnp.dot(h, w_fused, preferred_element_type=jnp.float32) + b_fused

    # Final hidden state stored exactly once.
    hfin_ref[...] = h


def _round_up(x, m):
    return ((x + m - 1) // m) * m


def _pad_gate_cols(w, h, hp):
    """Pad a (..., 4*h) gate-blocked array to (..., 4*hp) with per-gate zero pad."""
    if hp == h:
        return w
    lead = w.shape[:-1]
    w4 = w.reshape(lead + (4, h))
    w4 = jnp.pad(w4, [(0, 0)] * len(lead) + [(0, 0), (0, hp - h)])
    return w4.reshape(lead + (4 * hp,))


def decoder_forward(params, last_pos, last_pos_rel, state_tuple, seq_start_end,
                    seq_len):
    """JAX/Pallas equivalent of Decoder.forward (pool_every_timestep=False path)."""
    del last_pos, seq_start_end  # do not influence the returned tensors
    h0 = state_tuple[0][0]  # (batch, h_dim)  (num_layers == 1)
    c0 = state_tuple[1][0]
    batch = last_pos_rel.shape[0]
    emb = params["w_sp"].shape[1]
    h_dim = params["w_hh"].shape[0]

    # Pad batch to the f32 sublane multiple and h_dim to a full 128-lane tile
    # so each LSTM gate slice is vreg-aligned (no masked lane extraction).
    bp = _round_up(batch, 8)
    hp = _round_up(h_dim, 128)
    pad_b = bp - batch
    pad_h = hp - h_dim

    last_pos_rel_p = jnp.pad(last_pos_rel, ((0, pad_b), (0, 0)))
    h0_p = jnp.pad(h0, ((0, pad_b), (0, pad_h)))
    c0_p = jnp.pad(c0, ((0, pad_b), (0, pad_h)))

    w_sp = params["w_sp"]
    b_sp = params["b_sp"]
    w_ih = _pad_gate_cols(params["w_ih"], h_dim, hp)                    # (E, 4Hp)
    w_hh = jnp.pad(_pad_gate_cols(params["w_hh"], h_dim, hp),
                   ((0, pad_h), (0, 0)))                                # (Hp, 4Hp)
    b_lstm = _pad_gate_cols(params["b_lstm"], h_dim, hp)                # (1, 4Hp)
    w_hp = jnp.pad(params["w_hp"], ((0, pad_h), (0, 0)))                # (Hp, 2)
    b_hp = params["b_hp"]

    # Fused hidden2pos -> spatial_embedding (algebraically exact).
    w_fused = w_hp @ w_sp                                               # (Hp, E)
    b_fused = b_hp @ w_sp + b_sp                                        # (1, E)

    def full(shape):
        return pl.BlockSpec(shape, lambda i, _n=len(shape): (0,) * _n)

    pred, h_final = pl.pallas_call(
        decoder_kernel,
        out_shape=(jax.ShapeDtypeStruct((seq_len, bp, 2), jnp.float32),
                   jax.ShapeDtypeStruct((bp, hp), jnp.float32)),
        grid=(1,),
        in_specs=[
            full((bp, 2)),            # last_pos_rel
            full((bp, hp)),           # h0
            full((bp, hp)),           # c0
            full((2, emb)),           # spatial_embedding weight (in, out)
            full((1, emb)),           # spatial_embedding bias
            full((emb, 4 * hp)),      # LSTM W_ih (in, 4Hp)
            full((hp, 4 * hp)),       # LSTM W_hh (Hp, 4Hp)
            full((1, 4 * hp)),        # LSTM bias (b_ih + b_hh)
            full((hp, 2)),            # hidden2pos weight (Hp, 2)
            full((1, 2)),             # hidden2pos bias
            full((hp, emb)),          # fused hidden2pos->spatial_embedding W
            full((1, emb)),           # fused bias
        ],
        out_specs=(
            full((seq_len, bp, 2)),
            full((bp, hp)),
        ),
        compiler_params=pltpu.CompilerParams(
            dimension_semantics=("arbitrary",)),
    )(last_pos_rel_p, h0_p, c0_p,
      w_sp, b_sp, w_ih, w_hh, b_lstm, w_hp, b_hp, w_fused, b_fused)

    # Strip padding; PyTorch returns state_tuple[0] with its num_layers dim (==1).
    return pred[:, :batch, :], h_final[:batch, :h_dim][None]


def decoder_ref(params, last_pos_rel, state_tuple, seq_len):
    """Pure-JAX reference for verification (unpadded)."""
    H = params["w_hh"].shape[0]
    h, c = state_tuple[0][0], state_tuple[1][0]
    x = last_pos_rel @ params["w_sp"] + params["b_sp"]
    preds = []
    for _ in range(seq_len):
        gates = x @ params["w_ih"] + h @ params["w_hh"] + params["b_lstm"]
        i = jax.nn.sigmoid(gates[:, :H])
        f = jax.nn.sigmoid(gates[:, H:2 * H])
        g = jnp.tanh(gates[:, 2 * H:3 * H])
        o = jax.nn.sigmoid(gates[:, 3 * H:])
        c = f * c + i * g
        h = o * jnp.tanh(c)
        rel = h @ params["w_hp"] + params["b_hp"]
        preds.append(rel)
        x = rel @ params["w_sp"] + params["b_sp"]
    return jnp.stack(preds, 0), h[None]


def init_params(key, embedding_dim, h_dim):
    ks = jax.random.split(key, 8)
    s = 0.1
    return {
        "w_sp": (s * jax.random.normal(ks[0], (2, embedding_dim))).astype(jnp.float32),
        "b_sp": (s * jax.random.normal(ks[1], (1, embedding_dim))).astype(jnp.float32),
        "w_ih": (s * jax.random.normal(ks[2], (embedding_dim, 4 * h_dim))).astype(jnp.float32),
        "w_hh": (s * jax.random.normal(ks[3], (h_dim, 4 * h_dim))).astype(jnp.float32),
        "b_lstm": (s * jax.random.normal(ks[4], (1, 4 * h_dim))).astype(jnp.float32),
        "w_hp": (s * jax.random.normal(ks[5], (h_dim, 2))).astype(jnp.float32),
        "b_hp": (s * jax.random.normal(ks[6], (1, 2))).astype(jnp.float32),
    }


if __name__ == "__main__":
    seq_len = 8
    batch = 8
    embedding_dim = 32
    h_dim = 64

    key = jax.random.PRNGKey(0)
    kp, k1, k2, k3, k4 = jax.random.split(key, 5)
    params = init_params(kp, embedding_dim, h_dim)

    last_pos = jax.random.normal(k1, (batch, 2), dtype=jnp.float32)
    last_pos_rel = jax.random.normal(k2, (batch, 2), dtype=jnp.float32)
    h0 = jax.random.normal(k3, (1, batch, h_dim), dtype=jnp.float32)
    c0 = jax.random.normal(k4, (1, batch, h_dim), dtype=jnp.float32)
    state_tuple = (h0, c0)
    seq_start_end = jnp.array([[0, batch]], dtype=jnp.int32)  # unused (no pooling)

    pred, h_fin = decoder_forward(params, last_pos, last_pos_rel, state_tuple,
                                  seq_start_end, seq_len)
    jax.block_until_ready((pred, h_fin))

    pred_ref_v, h_ref_v = decoder_ref(params, last_pos_rel, state_tuple, seq_len)
    np.testing.assert_allclose(np.asarray(pred), np.asarray(pred_ref_v),
                               rtol=1e-4, atol=1e-5)
    np.testing.assert_allclose(np.asarray(h_fin), np.asarray(h_ref_v),
                               rtol=1e-4, atol=1e-5)

    assert pred.shape == (seq_len, batch, 2)
    assert h_fin.shape == (1, batch, h_dim)
    print("KERNEL_OK")
</pallas_src>

<mosaic_0001>
module attributes {stable_mosaic.version = 11 : i64} {
  func.func @decoder_kernel(%arg0: i32, %arg1: memref<8x2xf32, #tpu.memory_space<vmem>>, %arg2: memref<8x128xf32, #tpu.memory_space<vmem>>, %arg3: memref<8x128xf32, #tpu.memory_space<vmem>>, %arg4: memref<2x32xf32, #tpu.memory_space<vmem>>, %arg5: memref<1x32xf32, #tpu.memory_space<vmem>>, %arg6: memref<32x512xf32, #tpu.memory_space<vmem>>, %arg7: memref<128x512xf32, #tpu.memory_space<vmem>>, %arg8: memref<1x512xf32, #tpu.memory_space<vmem>>, %arg9: memref<128x2xf32, #tpu.memory_space<vmem>>, %arg10: memref<1x2xf32, #tpu.memory_space<vmem>>, %arg11: memref<128x32xf32, #tpu.memory_space<vmem>>, %arg12: memref<1x32xf32, #tpu.memory_space<vmem>>, %arg13: memref<8x8x2xf32, #tpu.memory_space<vmem>>, %arg14: memref<8x128xf32, #tpu.memory_space<vmem>>) attributes {dimension_semantics = [#tpu.dimension_semantics<arbitrary>], iteration_bounds = array<i64: 1>, scalar_prefetch = 0 : i64, scratch_operands = 0 : i64, tpu.core_type = #tpu.core_type<tc>, window_params = [{pipeline_mode = #tpu.pipeline_mode<synchronous>, transform_indices = @transform_0, window_bounds = array<i64: 8, 2>}, {pipeline_mode = #tpu.pipeline_mode<synchronous>, transform_indices = @transform_1, window_bounds = array<i64: 8, 128>}, {pipeline_mode = #tpu.pipeline_mode<synchronous>, transform_indices = @transform_2, window_bounds = array<i64: 8, 128>}, {pipeline_mode = #tpu.pipeline_mode<synchronous>, transform_indices = @transform_3, window_bounds = array<i64: 2, 32>}, {pipeline_mode = #tpu.pipeline_mode<synchronous>, transform_indices = @transform_4, window_bounds = array<i64: 1, 32>}, {pipeline_mode = #tpu.pipeline_mode<synchronous>, transform_indices = @transform_5, window_bounds = array<i64: 32, 512>}, {pipeline_mode = #tpu.pipeline_mode<synchronous>, transform_indices = @transform_6, window_bounds = array<i64: 128, 512>}, {pipeline_mode = #tpu.pipeline_mode<synchronous>, transform_indices = @transform_7, window_bounds = array<i64: 1, 512>}, {pipeline_mode = #tpu.pipeline_mode<synchronous>, transform_indices = @transform_8, window_bounds = array<i64: 128, 2>}, {pipeline_mode = #tpu.pipeline_mode<synchronous>, transform_indices = @transform_9, window_bounds = array<i64: 1, 2>}, {pipeline_mode = #tpu.pipeline_mode<synchronous>, transform_indices = @transform_10, window_bounds = array<i64: 128, 32>}, {pipeline_mode = #tpu.pipeline_mode<synchronous>, transform_indices = @transform_11, window_bounds = array<i64: 1, 32>}, {pipeline_mode = #tpu.pipeline_mode<synchronous>, transform_indices = @transform_12, window_bounds = array<i64: 8, 8, 2>}, {pipeline_mode = #tpu.pipeline_mode<synchronous>, transform_indices = @transform_13, window_bounds = array<i64: 8, 128>}]} {
    %c0 = arith.constant 0 : index
    %c0_0 = arith.constant 0 : index
    %0 = vector.load %arg6[%c0, %c0_0] : memref<32x512xf32, #tpu.memory_space<vmem>>, vector<32x512xf32>
    %c0_1 = arith.constant 0 : index
    %c0_2 = arith.constant 0 : index
    %1 = vector.load %arg7[%c0_1, %c0_2] : memref<128x512xf32, #tpu.memory_space<vmem>>, vector<128x512xf32>
    %c0_3 = arith.constant 0 : index
    %c0_4 = arith.constant 0 : index
    %2 = vector.load %arg8[%c0_3, %c0_4] : memref<1x512xf32, #tpu.memory_space<vmem>>, vector<1x512xf32>
    %c0_5 = arith.constant 0 : index
    %c0_6 = arith.constant 0 : index
    %3 = vector.load %arg9[%c0_5, %c0_6] : memref<128x2xf32, #tpu.memory_space<vmem>>, vector<128x2xf32>
    %c0_7 = arith.constant 0 : index
    %c0_8 = arith.constant 0 : index
    %4 = vector.load %arg10[%c0_7, %c0_8] : memref<1x2xf32, #tpu.memory_space<vmem>>, vector<1x2xf32>
    %c0_9 = arith.constant 0 : index
    %c0_10 = arith.constant 0 : index
    %5 = vector.load %arg11[%c0_9, %c0_10] : memref<128x32xf32, #tpu.memory_space<vmem>>, vector<128x32xf32>
    %c0_11 = arith.constant 0 : index
    %c0_12 = arith.constant 0 : index
    %6 = vector.load %arg12[%c0_11, %c0_12] : memref<1x32xf32, #tpu.memory_space<vmem>>, vector<1x32xf32>
    %c0_13 = arith.constant 0 : index
    %c0_14 = arith.constant 0 : index
    %7 = vector.load %arg1[%c0_13, %c0_14] : memref<8x2xf32, #tpu.memory_space<vmem>>, vector<8x2xf32>
    %c0_15 = arith.constant 0 : index
    %c0_16 = arith.constant 0 : index
    %8 = vector.load %arg4[%c0_15, %c0_16] : memref<2x32xf32, #tpu.memory_space<vmem>>, vector<2x32xf32>
    %cst = arith.constant dense<0.000000e+00> : vector<8x32xf32>
    %9 = tpu.matmul %7, %8, %cst {dimension_numbers = #tpu.dot_dimension_numbers<[1], [0], [0], [1], [0, 0, 1, 1], [], []>} : vector<8x2xf32>, vector<2x32xf32>, vector<8x32xf32> -> vector<8x32xf32>
    %c0_17 = arith.constant 0 : index
    %c0_18 = arith.constant 0 : index
    %10 = vector.load %arg5[%c0_17, %c0_18] : memref<1x32xf32, #tpu.memory_space<vmem>>, vector<1x32xf32>
    %11 = vector.broadcast %10 : vector<1x32xf32> to vector<8x32xf32>
    %12 = arith.addf %9, %11 : vector<8x32xf32>
    %c0_19 = arith.constant 0 : index
    %c0_20 = arith.constant 0 : index
    %13 = vector.load %arg2[%c0_19, %c0_20] : memref<8x128xf32, #tpu.memory_space<vmem>>, vector<8x128xf32>
    %c0_21 = arith.constant 0 : index
    %c0_22 = arith.constant 0 : index
    %14 = vector.load %arg3[%c0_21, %c0_22] : memref<8x128xf32, #tpu.memory_space<vmem>>, vector<8x128xf32>
    %cst_23 = arith.constant dense<0.000000e+00> : vector<8x512xf32>
    %15 = tpu.matmul %12, %0, %cst_23 {dimension_numbers = #tpu.dot_dimension_numbers<[1], [0], [0], [1], [0, 0, 1, 1], [], []>} : vector<8x32xf32>, vector<32x512xf32>, vector<8x512xf32> -> vector<8x512xf32>
    %cst_24 = arith.constant dense<0.000000e+00> : vector<8x512xf32>
    %16 = tpu.matmul %13, %1, %cst_24 {dimension_numbers = #tpu.dot_dimension_numbers<[1], [0], [0], [1], [0, 0, 1, 1], [], []>} : vector<8x128xf32>, vector<128x512xf32>, vector<8x512xf32> -> vector<8x512xf32>
    %17 = arith.addf %15, %16 : vector<8x512xf32>
    %18 = vector.broadcast %2 : vector<1x512xf32> to vector<8x512xf32>
    %19 = arith.addf %17, %18 : vector<8x512xf32>
    %20 = vector.extract_strided_slice %19 {offsets = [0, 0], sizes = [8, 128], strides = [1, 1]} : vector<8x512xf32> to vector<8x128xf32>
    %21 = arith.negf %20 : vector<8x128xf32>
    %22 = math.exp %21 : vector<8x128xf32>
    %cst_25 = arith.constant 1.000000e+00 : f32
    %23 = vector.broadcast %cst_25 : f32 to vector<8x128xf32>
    %24 = arith.addf %23, %22 : vector<8x128xf32>
    %25 = arith.divf %23, %24 : vector<8x128xf32>
    %26 = vector.extract_strided_slice %19 {offsets = [0, 128], sizes = [8, 128], strides = [1, 1]} : vector<8x512xf32> to vector<8x128xf32>
    %27 = arith.negf %26 : vector<8x128xf32>
    %28 = math.exp %27 : vector<8x128xf32>
    %cst_26 = arith.constant 1.000000e+00 : f32
    %29 = vector.broadcast %cst_26 : f32 to vector<8x128xf32>
    %30 = arith.addf %29, %28 : vector<8x128xf32>
    %31 = arith.divf %29, %30 : vector<8x128xf32>
    %32 = vector.extract_strided_slice %19 {offsets = [0, 256], sizes = [8, 128], strides = [1, 1]} : vector<8x512xf32> to vector<8x128xf32>
    %33 = math.tanh %32 : vector<8x128xf32>
    %34 = vector.extract_strided_slice %19 {offsets = [0, 384], sizes = [8, 128], strides = [1, 1]} : vector<8x512xf32> to vector<8x128xf32>
    %35 = arith.negf %34 : vector<8x128xf32>
    %36 = math.exp %35 : vector<8x128xf32>
    %cst_27 = arith.constant 1.000000e+00 : f32
    %37 = vector.broadcast %cst_27 : f32 to vector<8x128xf32>
    %38 = arith.addf %37, %36 : vector<8x128xf32>
    %39 = arith.divf %37, %38 : vector<8x128xf32>
    %40 = arith.mulf %31, %14 : vector<8x128xf32>
    %41 = arith.mulf %25, %33 : vector<8x128xf32>
    %42 = arith.addf %40, %41 : vector<8x128xf32>
    %43 = math.tanh %42 : vector<8x128xf32>
    %44 = arith.mulf %39, %43 : vector<8x128xf32>
    %cst_28 = arith.constant dense<0.000000e+00> : vector<8x2xf32>
    %45 = tpu.matmul %44, %3, %cst_28 {dimension_numbers = #tpu.dot_dimension_numbers<[1], [0], [0], [1], [0, 0, 1, 1], [], []>} : vector<8x128xf32>, vector<128x2xf32>, vector<8x2xf32> -> vector<8x2xf32>
    %46 = vector.broadcast %4 : vector<1x2xf32> to vector<8x2xf32>
    %47 = arith.addf %45, %46 : vector<8x2xf32>
    %c0_29 = arith.constant 0 : index
    %c0_30 = arith.constant 0 : index
    %c0_31 = arith.constant 0 : index
    %48 = vector.load %arg13[%c0_29, %c0_30, %c0_31] : memref<8x8x2xf32, #tpu.memory_space<vmem>>, vector<1x8x2xf32>
    %49 = vector.shape_cast %48 : vector<1x8x2xf32> to vector<8x2xf32>
    %50 = vector.shape_cast %47 : vector<8x2xf32> to vector<1x8x2xf32>
    tpu.vector_store %arg13[%c0_29, %c0_30, %c0_31], %50 {strides = array<i32>} : memref<8x8x2xf32, #tpu.memory_space<vmem>>, vector<1x8x2xf32>,
    %cst_32 = arith.constant dense<0.000000e+00> : vector<8x32xf32>
    %51 = tpu.matmul %44, %5, %cst_32 {dimension_numbers = #tpu.dot_dimension_numbers<[1], [0], [0], [1], [0, 0, 1, 1], [], []>} : vector<8x128xf32>, vector<128x32xf32>, vector<8x32xf32> -> vector<8x32xf32>
    %52 = vector.broadcast %6 : vector<1x32xf32> to vector<8x32xf32>
    %53 = arith.addf %51, %52 : vector<8x32xf32>
    %cst_33 = arith.constant dense<0.000000e+00> : vector<8x512xf32>
    %54 = tpu.matmul %53, %0, %cst_33 {dimension_numbers = #tpu.dot_dimension_numbers<[1], [0], [0], [1], [0, 0, 1, 1], [], []>} : vector<8x32xf32>, vector<32x512xf32>, vector<8x512xf32> -> vector<8x512xf32>
    %cst_34 = arith.constant dense<0.000000e+00> : vector<8x512xf32>
    %55 = tpu.matmul %44, %1, %cst_34 {dimension_numbers = #tpu.dot_dimension_numbers<[1], [0], [0], [1], [0, 0, 1, 1], [], []>} : vector<8x128xf32>, vector<128x512xf32>, vector<8x512xf32> -> vector<8x512xf32>
    %56 = arith.addf %54, %55 : vector<8x512xf32>
    %57 = vector.broadcast %2 : vector<1x512xf32> to vector<8x512xf32>
    %58 = arith.addf %56, %57 : vector<8x512xf32>
    %59 = vector.extract_strided_slice %58 {offsets = [0, 0], sizes = [8, 128], strides = [1, 1]} : vector<8x512xf32> to vector<8x128xf32>
    %60 = arith.negf %59 : vector<8x128xf32>
    %61 = math.exp %60 : vector<8x128xf32>
    %cst_35 = arith.constant 1.000000e+00 : f32
    %62 = vector.broadcast %cst_35 : f32 to vector<8x128xf32>
    %63 = arith.addf %62, %61 : vector<8x128xf32>
    %64 = arith.divf %62, %63 : vector<8x128xf32>
    %65 = vector.extract_strided_slice %58 {offsets = [0, 128], sizes = [8, 128], strides = [1, 1]} : vector<8x512xf32> to vector<8x128xf32>
    %66 = arith.negf %65 : vector<8x128xf32>
    %67 = math.exp %66 : vector<8x128xf32>
    %cst_36 = arith.constant 1.000000e+00 : f32
    %68 = vector.broadcast %cst_36 : f32 to vector<8x128xf32>
    %69 = arith.addf %68, %67 : vector<8x128xf32>
    %70 = arith.divf %68, %69 : vector<8x128xf32>
    %71 = vector.extract_strided_slice %58 {offsets = [0, 256], sizes = [8, 128], strides = [1, 1]} : vector<8x512xf32> to vector<8x128xf32>
    %72 = math.tanh %71 : vector<8x128xf32>
    %73 = vector.extract_strided_slice %58 {offsets = [0, 384], sizes = [8, 128], strides = [1, 1]} : vector<8x512xf32> to vector<8x128xf32>
    %74 = arith.negf %73 : vector<8x128xf32>
    %75 = math.exp %74 : vector<8x128xf32>
    %cst_37 = arith.constant 1.000000e+00 : f32
    %76 = vector.broadcast %cst_37 : f32 to vector<8x128xf32>
    %77 = arith.addf %76, %75 : vector<8x128xf32>
    %78 = arith.divf %76, %77 : vector<8x128xf32>
    %79 = arith.mulf %70, %42 : vector<8x128xf32>
    %80 = arith.mulf %64, %72 : vector<8x128xf32>
    %81 = arith.addf %79, %80 : vector<8x128xf32>
    %82 = math.tanh %81 : vector<8x128xf32>
    %83 = arith.mulf %78, %82 : vector<8x128xf32>
    %cst_38 = arith.constant dense<0.000000e+00> : vector<8x2xf32>
    %84 = tpu.matmul %83, %3, %cst_38 {dimension_numbers = #tpu.dot_dimension_numbers<[1], [0], [0], [1], [0, 0, 1, 1], [], []>} : vector<8x128xf32>, vector<128x2xf32>, vector<8x2xf32> -> vector<8x2xf32>
    %85 = vector.broadcast %4 : vector<1x2xf32> to vector<8x2xf32>
    %86 = arith.addf %84, %85 : vector<8x2xf32>
    %c1 = arith.constant 1 : index
    %c0_39 = arith.constant 0 : index
    %c0_40 = arith.constant 0 : index
    %87 = vector.load %arg13[%c1, %c0_39, %c0_40] : memref<8x8x2xf32, #tpu.memory_space<vmem>>, vector<1x8x2xf32>
    %88 = vector.shape_cast %87 : vector<1x8x2xf32> to vector<8x2xf32>
    %89 = vector.shape_cast %86 : vector<8x2xf32> to vector<1x8x2xf32>
    tpu.vector_store %arg13[%c1, %c0_39, %c0_40], %89 {strides = array<i32>} : memref<8x8x2xf32, #tpu.memory_space<vmem>>, vector<1x8x2xf32>,
    %cst_41 = arith.constant dense<0.000000e+00> : vector<8x32xf32>
    %90 = tpu.matmul %83, %5, %cst_41 {dimension_numbers = #tpu.dot_dimension_numbers<[1], [0], [0], [1], [0, 0, 1, 1], [], []>} : vector<8x128xf32>, vector<128x32xf32>, vector<8x32xf32> -> vector<8x32xf32>
    %91 = vector.broadcast %6 : vector<1x32xf32> to vector<8x32xf32>
    %92 = arith.addf %90, %91 : vector<8x32xf32>
    %cst_42 = arith.constant dense<0.000000e+00> : vector<8x512xf32>
    %93 = tpu.matmul %92, %0, %cst_42 {dimension_numbers = #tpu.dot_dimension_numbers<[1], [0], [0], [1], [0, 0, 1, 1], [], []>} : vector<8x32xf32>, vector<32x512xf32>, vector<8x512xf32> -> vector<8x512xf32>
    %cst_43 = arith.constant dense<0.000000e+00> : vector<8x512xf32>
    %94 = tpu.matmul %83, %1, %cst_43 {dimension_numbers = #tpu.dot_dimension_numbers<[1], [0], [0], [1], [0, 0, 1, 1], [], []>} : vector<8x128xf32>, vector<128x512xf32>, vector<8x512xf32> -> vector<8x512xf32>
    %95 = arith.addf %93, %94 : vector<8x512xf32>
    %96 = vector.broadcast %2 : vector<1x512xf32> to vector<8x512xf32>
    %97 = arith.addf %95, %96 : vector<8x512xf32>
    %98 = vector.extract_strided_slice %97 {offsets = [0, 0], sizes = [8, 128], strides = [1, 1]} : vector<8x512xf32> to vector<8x128xf32>
    %99 = arith.negf %98 : vector<8x128xf32>
    %100 = math.exp %99 : vector<8x128xf32>
    %cst_44 = arith.constant 1.000000e+00 : f32
    %101 = vector.broadcast %cst_44 : f32 to vector<8x128xf32>
    %102 = arith.addf %101, %100 : vector<8x128xf32>
    %103 = arith.divf %101, %102 : vector<8x128xf32>
    %104 = vector.extract_strided_slice %97 {offsets = [0, 128], sizes = [8, 128], strides = [1, 1]} : vector<8x512xf32> to vector<8x128xf32>
    %105 = arith.negf %104 : vector<8x128xf32>
    %106 = math.exp %105 : vector<8x128xf32>
    %cst_45 = arith.constant 1.000000e+00 : f32
    %107 = vector.broadcast %cst_45 : f32 to vector<8x128xf32>
    %108 = arith.addf %107, %106 : vector<8x128xf32>
    %109 = arith.divf %107, %108 : vector<8x128xf32>
    %110 = vector.extract_strided_slice %97 {offsets = [0, 256], sizes = [8, 128], strides = [1, 1]} : vector<8x512xf32> to vector<8x128xf32>
    %111 = math.tanh %110 : vector<8x128xf32>
    %112 = vector.extract_strided_slice %97 {offsets = [0, 384], sizes = [8, 128], strides = [1, 1]} : vector<8x512xf32> to vector<8x128xf32>
    %113 = arith.negf %112 : vector<8x128xf32>
    %114 = math.exp %113 : vector<8x128xf32>
    %cst_46 = arith.constant 1.000000e+00 : f32
    %115 = vector.broadcast %cst_46 : f32 to vector<8x128xf32>
    %116 = arith.addf %115, %114 : vector<8x128xf32>
    %117 = arith.divf %115, %116 : vector<8x128xf32>
    %118 = arith.mulf %109, %81 : vector<8x128xf32>
    %119 = arith.mulf %103, %111 : vector<8x128xf32>
    %120 = arith.addf %118, %119 : vector<8x128xf32>
    %121 = math.tanh %120 : vector<8x128xf32>
    %122 = arith.mulf %117, %121 : vector<8x128xf32>
    %cst_47 = arith.constant dense<0.000000e+00> : vector<8x2xf32>
    %123 = tpu.matmul %122, %3, %cst_47 {dimension_numbers = #tpu.dot_dimension_numbers<[1], [0], [0], [1], [0, 0, 1, 1], [], []>} : vector<8x128xf32>, vector<128x2xf32>, vector<8x2xf32> -> vector<8x2xf32>
    %124 = vector.broadcast %4 : vector<1x2xf32> to vector<8x2xf32>
    %125 = arith.addf %123, %124 : vector<8x2xf32>
    %c2 = arith.constant 2 : index
    %c0_48 = arith.constant 0 : index
    %c0_49 = arith.constant 0 : index
    %126 = vector.load %arg13[%c2, %c0_48, %c0_49] : memref<8x8x2xf32, #tpu.memory_space<vmem>>, vector<1x8x2xf32>
    %127 = vector.shape_cast %126 : vector<1x8x2xf32> to vector<8x2xf32>
    %128 = vector.shape_cast %125 : vector<8x2xf32> to vector<1x8x2xf32>
    tpu.vector_store %arg13[%c2, %c0_48, %c0_49], %128 {strides = array<i32>} : memref<8x8x2xf32, #tpu.memory_space<vmem>>, vector<1x8x2xf32>,
    %cst_50 = arith.constant dense<0.000000e+00> : vector<8x32xf32>
    %129 = tpu.matmul %122, %5, %cst_50 {dimension_numbers = #tpu.dot_dimension_numbers<[1], [0], [0], [1], [0, 0, 1, 1], [], []>} : vector<8x128xf32>, vector<128x32xf32>, vector<8x32xf32> -> vector<8x32xf32>
    %130 = vector.broadcast %6 : vector<1x32xf32> to vector<8x32xf32>
    %131 = arith.addf %129, %130 : vector<8x32xf32>
    %cst_51 = arith.constant dense<0.000000e+00> : vector<8x512xf32>
    %132 = tpu.matmul %131, %0, %cst_51 {dimension_numbers = #tpu.dot_dimension_numbers<[1], [0], [0], [1], [0, 0, 1, 1], [], []>} : vector<8x32xf32>, vector<32x512xf32>, vector<8x512xf32> -> vector<8x512xf32>
    %cst_52 = arith.constant dense<0.000000e+00> : vector<8x512xf32>
    %133 = tpu.matmul %122, %1, %cst_52 {dimension_numbers = #tpu.dot_dimension_numbers<[1], [0], [0], [1], [0, 0, 1, 1], [], []>} : vector<8x128xf32>, vector<128x512xf32>, vector<8x512xf32> -> vector<8x512xf32>
    %134 = arith.addf %132, %133 : vector<8x512xf32>
    %135 = vector.broadcast %2 : vector<1x512xf32> to vector<8x512xf32>
    %136 = arith.addf %134, %135 : vector<8x512xf32>
    %137 = vector.extract_strided_slice %136 {offsets = [0, 0], sizes = [8, 128], strides = [1, 1]} : vector<8x512xf32> to vector<8x128xf32>
    %138 = arith.negf %137 : vector<8x128xf32>
    %139 = math.exp %138 : vector<8x128xf32>
    %cst_53 = arith.constant 1.000000e+00 : f32
    %140 = vector.broadcast %cst_53 : f32 to vector<8x128xf32>
    %141 = arith.addf %140, %139 : vector<8x128xf32>
    %142 = arith.divf %140, %141 : vector<8x128xf32>
    %143 = vector.extract_strided_slice %136 {offsets = [0, 128], sizes = [8, 128], strides = [1, 1]} : vector<8x512xf32> to vector<8x128xf32>
    %144 = arith.negf %143 : vector<8x128xf32>
    %145 = math.exp %144 : vector<8x128xf32>
    %cst_54 = arith.constant 1.000000e+00 : f32
    %146 = vector.broadcast %cst_54 : f32 to vector<8x128xf32>
    %147 = arith.addf %146, %145 : vector<8x128xf32>
    %148 = arith.divf %146, %147 : vector<8x128xf32>
    %149 = vector.extract_strided_slice %136 {offsets = [0, 256], sizes = [8, 128], strides = [1, 1]} : vector<8x512xf32> to vector<8x128xf32>
    %150 = math.tanh %149 : vector<8x128xf32>
    %151 = vector.extract_strided_slice %136 {offsets = [0, 384], sizes = [8, 128], strides = [1, 1]} : vector<8x512xf32> to vector<8x128xf32>
    %152 = arith.negf %151 : vector<8x128xf32>
    %153 = math.exp %152 : vector<8x128xf32>
    %cst_55 = arith.constant 1.000000e+00 : f32
    %154 = vector.broadcast %cst_55 : f32 to vector<8x128xf32>
    %155 = arith.addf %154, %153 : vector<8x128xf32>
    %156 = arith.divf %154, %155 : vector<8x128xf32>
    %157 = arith.mulf %148, %120 : vector<8x128xf32>
    %158 = arith.mulf %142, %150 : vector<8x128xf32>
    %159 = arith.addf %157, %158 : vector<8x128xf32>
    %160 = math.tanh %159 : vector<8x128xf32>
    %161 = arith.mulf %156, %160 : vector<8x128xf32>
    %cst_56 = arith.constant dense<0.000000e+00> : vector<8x2xf32>
    %162 = tpu.matmul %161, %3, %cst_56 {dimension_numbers = #tpu.dot_dimension_numbers<[1], [0], [0], [1], [0, 0, 1, 1], [], []>} : vector<8x128xf32>, vector<128x2xf32>, vector<8x2xf32> -> vector<8x2xf32>
    %163 = vector.broadcast %4 : vector<1x2xf32> to vector<8x2xf32>
    %164 = arith.addf %162, %163 : vector<8x2xf32>
    %c3 = arith.constant 3 : index
    %c0_57 = arith.constant 0 : index
    %c0_58 = arith.constant 0 : index
    %165 = vector.load %arg13[%c3, %c0_57, %c0_58] : memref<8x8x2xf32, #tpu.memory_space<vmem>>, vector<1x8x2xf32>
    %166 = vector.shape_cast %165 : vector<1x8x2xf32> to vector<8x2xf32>
    %167 = vector.shape_cast %164 : vector<8x2xf32> to vector<1x8x2xf32>
    tpu.vector_store %arg13[%c3, %c0_57, %c0_58], %167 {strides = array<i32>} : memref<8x8x2xf32, #tpu.memory_space<vmem>>, vector<1x8x2xf32>,
    %cst_59 = arith.constant dense<0.000000e+00> : vector<8x32xf32>
    %168 = tpu.matmul %161, %5, %cst_59 {dimension_numbers = #tpu.dot_dimension_numbers<[1], [0], [0], [1], [0, 0, 1, 1], [], []>} : vector<8x128xf32>, vector<128x32xf32>, vector<8x32xf32> -> vector<8x32xf32>
    %169 = vector.broadcast %6 : vector<1x32xf32> to vector<8x32xf32>
    %170 = arith.addf %168, %169 : vector<8x32xf32>
    %cst_60 = arith.constant dense<0.000000e+00> : vector<8x512xf32>
    %171 = tpu.matmul %170, %0, %cst_60 {dimension_numbers = #tpu.dot_dimension_numbers<[1], [0], [0], [1], [0, 0, 1, 1], [], []>} : vector<8x32xf32>, vector<32x512xf32>, vector<8x512xf32> -> vector<8x512xf32>
    %cst_61 = arith.constant dense<0.000000e+00> : vector<8x512xf32>
    %172 = tpu.matmul %161, %1, %cst_61 {dimension_numbers = #tpu.dot_dimension_numbers<[1], [0], [0], [1], [0, 0, 1, 1], [], []>} : vector<8x128xf32>, vector<128x512xf32>, vector<8x512xf32> -> vector<8x512xf32>
    %173 = arith.addf %171, %172 : vector<8x512xf32>
    %174 = vector.broadcast %2 : vector<1x512xf32> to vector<8x512xf32>
    %175 = arith.addf %173, %174 : vector<8x512xf32>
    %176 = vector.extract_strided_slice %175 {offsets = [0, 0], sizes = [8, 128], strides = [1, 1]} : vector<8x512xf32> to vector<8x128xf32>
    %177 = arith.negf %176 : vector<8x128xf32>
    %178 = math.exp %177 : vector<8x128xf32>
    %cst_62 = arith.constant 1.000000e+00 : f32
    %179 = vector.broadcast %cst_62 : f32 to vector<8x128xf32>
    %180 = arith.addf %179, %178 : vector<8x128xf32>
    %181 = arith.divf %179, %180 : vector<8x128xf32>
    %182 = vector.extract_strided_slice %175 {offsets = [0, 128], sizes = [8, 128], strides = [1, 1]} : vector<8x512xf32> to vector<8x128xf32>
    %183 = arith.negf %182 : vector<8x128xf32>
    %184 = math.exp %183 : vector<8x128xf32>
    %cst_63 = arith.constant 1.000000e+00 : f32
    %185 = vector.broadcast %cst_63 : f32 to vector<8x128xf32>
    %186 = arith.addf %185, %184 : vector<8x128xf32>
    %187 = arith.divf %185, %186 : vector<8x128xf32>
    %188 = vector.extract_strided_slice %175 {offsets = [0, 256], sizes = [8, 128], strides = [1, 1]} : vector<8x512xf32> to vector<8x128xf32>
    %189 = math.tanh %188 : vector<8x128xf32>
    %190 = vector.extract_strided_slice %175 {offsets = [0, 384], sizes = [8, 128], strides = [1, 1]} : vector<8x512xf32> to vector<8x128xf32>
    %191 = arith.negf %190 : vector<8x128xf32>
    %192 = math.exp %191 : vector<8x128xf32>
    %cst_64 = arith.constant 1.000000e+00 : f32
    %193 = vector.broadcast %cst_64 : f32 to vector<8x128xf32>
    %194 = arith.addf %193, %192 : vector<8x128xf32>
    %195 = arith.divf %193, %194 : vector<8x128xf32>
    %196 = arith.mulf %187, %159 : vector<8x128xf32>
    %197 = arith.mulf %181, %189 : vector<8x128xf32>
    %198 = arith.addf %196, %197 : vector<8x128xf32>
    %199 = math.tanh %198 : vector<8x128xf32>
    %200 = arith.mulf %195, %199 : vector<8x128xf32>
    %cst_65 = arith.constant dense<0.000000e+00> : vector<8x2xf32>
    %201 = tpu.matmul %200, %3, %cst_65 {dimension_numbers = #tpu.dot_dimension_numbers<[1], [0], [0], [1], [0, 0, 1, 1], [], []>} : vector<8x128xf32>, vector<128x2xf32>, vector<8x2xf32> -> vector<8x2xf32>
    %202 = vector.broadcast %4 : vector<1x2xf32> to vector<8x2xf32>
    %203 = arith.addf %201, %202 : vector<8x2xf32>
    %c4 = arith.constant 4 : index
    %c0_66 = arith.constant 0 : index
    %c0_67 = arith.constant 0 : index
    %204 = vector.load %arg13[%c4, %c0_66, %c0_67] : memref<8x8x2xf32, #tpu.memory_space<vmem>>, vector<1x8x2xf32>
    %205 = vector.shape_cast %204 : vector<1x8x2xf32> to vector<8x2xf32>
    %206 = vector.shape_cast %203 : vector<8x2xf32> to vector<1x8x2xf32>
    tpu.vector_store %arg13[%c4, %c0_66, %c0_67], %206 {strides = array<i32>} : memref<8x8x2xf32, #tpu.memory_space<vmem>>, vector<1x8x2xf32>,
    %cst_68 = arith.constant dense<0.000000e+00> : vector<8x32xf32>
    %207 = tpu.matmul %200, %5, %cst_68 {dimension_numbers = #tpu.dot_dimension_numbers<[1], [0], [0], [1], [0, 0, 1, 1], [], []>} : vector<8x128xf32>, vector<128x32xf32>, vector<8x32xf32> -> vector<8x32xf32>
    %208 = vector.broadcast %6 : vector<1x32xf32> to vector<8x32xf32>
    %209 = arith.addf %207, %208 : vector<8x32xf32>
    %cst_69 = arith.constant dense<0.000000e+00> : vector<8x512xf32>
    %210 = tpu.matmul %209, %0, %cst_69 {dimension_numbers = #tpu.dot_dimension_numbers<[1], [0], [0], [1], [0, 0, 1, 1], [], []>} : vector<8x32xf32>, vector<32x512xf32>, vector<8x512xf32> -> vector<8x512xf32>
    %cst_70 = arith.constant dense<0.000000e+00> : vector<8x512xf32>
    %211 = tpu.matmul %200, %1, %cst_70 {dimension_numbers = #tpu.dot_dimension_numbers<[1], [0], [0], [1], [0, 0, 1, 1], [], []>} : vector<8x128xf32>, vector<128x512xf32>, vector<8x512xf32> -> vector<8x512xf32>
    %212 = arith.addf %210, %211 : vector<8x512xf32>
    %213 = vector.broadcast %2 : vector<1x512xf32> to vector<8x512xf32>
    %214 = arith.addf %212, %213 : vector<8x512xf32>
    %215 = vector.extract_strided_slice %214 {offsets = [0, 0], sizes = [8, 128], strides = [1, 1]} : vector<8x512xf32> to vector<8x128xf32>
    %216 = arith.negf %215 : vector<8x128xf32>
    %217 = math.exp %216 : vector<8x128xf32>
    %cst_71 = arith.constant 1.000000e+00 : f32
    %218 = vector.broadcast %cst_71 : f32 to vector<8x128xf32>
    %219 = arith.addf %218, %217 : vector<8x128xf32>
    %220 = arith.divf %218, %219 : vector<8x128xf32>
    %221 = vector.extract_strided_slice %214 {offsets = [0, 128], sizes = [8, 128], strides = [1, 1]} : vector<8x512xf32> to vector<8x128xf32>
    %222 = arith.negf %221 : vector<8x128xf32>
    %223 = math.exp %222 : vector<8x128xf32>
    %cst_72 = arith.constant 1.000000e+00 : f32
    %224 = vector.broadcast %cst_72 : f32 to vector<8x128xf32>
    %225 = arith.addf %224, %223 : vector<8x128xf32>
    %226 = arith.divf %224, %225 : vector<8x128xf32>
    %227 = vector.extract_strided_slice %214 {offsets = [0, 256], sizes = [8, 128], strides = [1, 1]} : vector<8x512xf32> to vector<8x128xf32>
    %228 = math.tanh %227 : vector<8x128xf32>
    %229 = vector.extract_strided_slice %214 {offsets = [0, 384], sizes = [8, 128], strides = [1, 1]} : vector<8x512xf32> to vector<8x128xf32>
    %230 = arith.negf %229 : vector<8x128xf32>
    %231 = math.exp %230 : vector<8x128xf32>
    %cst_73 = arith.constant 1.000000e+00 : f32
    %232 = vector.broadcast %cst_73 : f32 to vector<8x128xf32>
    %233 = arith.addf %232, %231 : vector<8x128xf32>
    %234 = arith.divf %232, %233 : vector<8x128xf32>
    %235 = arith.mulf %226, %198 : vector<8x128xf32>
    %236 = arith.mulf %220, %228 : vector<8x128xf32>
    %237 = arith.addf %235, %236 : vector<8x128xf32>
    %238 = math.tanh %237 : vector<8x128xf32>
    %239 = arith.mulf %234, %238 : vector<8x128xf32>
    %cst_74 = arith.constant dense<0.000000e+00> : vector<8x2xf32>
    %240 = tpu.matmul %239, %3, %cst_74 {dimension_numbers = #tpu.dot_dimension_numbers<[1], [0], [0], [1], [0, 0, 1, 1], [], []>} : vector<8x128xf32>, vector<128x2xf32>, vector<8x2xf32> -> vector<8x2xf32>
    %241 = vector.broadcast %4 : vector<1x2xf32> to vector<8x2xf32>
    %242 = arith.addf %240, %241 : vector<8x2xf32>
    %c5 = arith.constant 5 : index
    %c0_75 = arith.constant 0 : index
    %c0_76 = arith.constant 0 : index
    %243 = vector.load %arg13[%c5, %c0_75, %c0_76] : memref<8x8x2xf32, #tpu.memory_space<vmem>>, vector<1x8x2xf32>
    %244 = vector.shape_cast %243 : vector<1x8x2xf32> to vector<8x2xf32>
    %245 = vector.shape_cast %242 : vector<8x2xf32> to vector<1x8x2xf32>
    tpu.vector_store %arg13[%c5, %c0_75, %c0_76], %245 {strides = array<i32>} : memref<8x8x2xf32, #tpu.memory_space<vmem>>, vector<1x8x2xf32>,
    %cst_77 = arith.constant dense<0.000000e+00> : vector<8x32xf32>
    %246 = tpu.matmul %239, %5, %cst_77 {dimension_numbers = #tpu.dot_dimension_numbers<[1], [0], [0], [1], [0, 0, 1, 1], [], []>} : vector<8x128xf32>, vector<128x32xf32>, vector<8x32xf32> -> vector<8x32xf32>
    %247 = vector.broadcast %6 : vector<1x32xf32> to vector<8x32xf32>
    %248 = arith.addf %246, %247 : vector<8x32xf32>
    %cst_78 = arith.constant dense<0.000000e+00> : vector<8x512xf32>
    %249 = tpu.matmul %248, %0, %cst_78 {dimension_numbers = #tpu.dot_dimension_numbers<[1], [0], [0], [1], [0, 0, 1, 1], [], []>} : vector<8x32xf32>, vector<32x512xf32>, vector<8x512xf32> -> vector<8x512xf32>
    %cst_79 = arith.constant dense<0.000000e+00> : vector<8x512xf32>
    %250 = tpu.matmul %239, %1, %cst_79 {dimension_numbers = #tpu.dot_dimension_numbers<[1], [0], [0], [1], [0, 0, 1, 1], [], []>} : vector<8x128xf32>, vector<128x512xf32>, vector<8x512xf32> -> vector<8x512xf32>
    %251 = arith.addf %249, %250 : vector<8x512xf32>
    %252 = vector.broadcast %2 : vector<1x512xf32> to vector<8x512xf32>
    %253 = arith.addf %251, %252 : vector<8x512xf32>
    %254 = vector.extract_strided_slice %253 {offsets = [0, 0], sizes = [8, 128], strides = [1, 1]} : vector<8x512xf32> to vector<8x128xf32>
    %255 = arith.negf %254 : vector<8x128xf32>
    %256 = math.exp %255 : vector<8x128xf32>
    %cst_80 = arith.constant 1.000000e+00 : f32
    %257 = vector.broadcast %cst_80 : f32 to vector<8x128xf32>
    %258 = arith.addf %257, %256 : vector<8x128xf32>
    %259 = arith.divf %257, %258 : vector<8x128xf32>
    %260 = vector.extract_strided_slice %253 {offsets = [0, 128], sizes = [8, 128], strides = [1, 1]} : vector<8x512xf32> to vector<8x128xf32>
    %261 = arith.negf %260 : vector<8x128xf32>
    %262 = math.exp %261 : vector<8x128xf32>
    %cst_81 = arith.constant 1.000000e+00 : f32
    %263 = vector.broadcast %cst_81 : f32 to vector<8x128xf32>
    %264 = arith.addf %263, %262 : vector<8x128xf32>
    %265 = arith.divf %263, %264 : vector<8x128xf32>
    %266 = vector.extract_strided_slice %253 {offsets = [0, 256], sizes = [8, 128], strides = [1, 1]} : vector<8x512xf32> to vector<8x128xf32>
    %267 = math.tanh %266 : vector<8x128xf32>
    %268 = vector.extract_strided_slice %253 {offsets = [0, 384], sizes = [8, 128], strides = [1, 1]} : vector<8x512xf32> to vector<8x128xf32>
    %269 = arith.negf %268 : vector<8x128xf32>
    %270 = math.exp %269 : vector<8x128xf32>
    %cst_82 = arith.constant 1.000000e+00 : f32
    %271 = vector.broadcast %cst_82 : f32 to vector<8x128xf32>
    %272 = arith.addf %271, %270 : vector<8x128xf32>
    %273 = arith.divf %271, %272 : vector<8x128xf32>
    %274 = arith.mulf %265, %237 : vector<8x128xf32>
    %275 = arith.mulf %259, %267 : vector<8x128xf32>
    %276 = arith.addf %274, %275 : vector<8x128xf32>
    %277 = math.tanh %276 : vector<8x128xf32>
    %278 = arith.mulf %273, %277 : vector<8x128xf32>
    %cst_83 = arith.constant dense<0.000000e+00> : vector<8x2xf32>
    %279 = tpu.matmul %278, %3, %cst_83 {dimension_numbers = #tpu.dot_dimension_numbers<[1], [0], [0], [1], [0, 0, 1, 1], [], []>} : vector<8x128xf32>, vector<128x2xf32>, vector<8x2xf32> -> vector<8x2xf32>
    %280 = vector.broadcast %4 : vector<1x2xf32> to vector<8x2xf32>
    %281 = arith.addf %279, %280 : vector<8x2xf32>
    %c6 = arith.constant 6 : index
    %c0_84 = arith.constant 0 : index
    %c0_85 = arith.constant 0 : index
    %282 = vector.load %arg13[%c6, %c0_84, %c0_85] : memref<8x8x2xf32, #tpu.memory_space<vmem>>, vector<1x8x2xf32>
    %283 = vector.shape_cast %282 : vector<1x8x2xf32> to vector<8x2xf32>
    %284 = vector.shape_cast %281 : vector<8x2xf32> to vector<1x8x2xf32>
    tpu.vector_store %arg13[%c6, %c0_84, %c0_85], %284 {strides = array<i32>} : memref<8x8x2xf32, #tpu.memory_space<vmem>>, vector<1x8x2xf32>,
    %cst_86 = arith.constant dense<0.000000e+00> : vector<8x32xf32>
    %285 = tpu.matmul %278, %5, %cst_86 {dimension_numbers = #tpu.dot_dimension_numbers<[1], [0], [0], [1], [0, 0, 1, 1], [], []>} : vector<8x128xf32>, vector<128x32xf32>, vector<8x32xf32> -> vector<8x32xf32>
    %286 = vector.broadcast %6 : vector<1x32xf32> to vector<8x32xf32>
    %287 = arith.addf %285, %286 : vector<8x32xf32>
    %cst_87 = arith.constant dense<0.000000e+00> : vector<8x512xf32>
    %288 = tpu.matmul %287, %0, %cst_87 {dimension_numbers = #tpu.dot_dimension_numbers<[1], [0], [0], [1], [0, 0, 1, 1], [], []>} : vector<8x32xf32>, vector<32x512xf32>, vector<8x512xf32> -> vector<8x512xf32>
    %cst_88 = arith.constant dense<0.000000e+00> : vector<8x512xf32>
    %289 = tpu.matmul %278, %1, %cst_88 {dimension_numbers = #tpu.dot_dimension_numbers<[1], [0], [0], [1], [0, 0, 1, 1], [], []>} : vector<8x128xf32>, vector<128x512xf32>, vector<8x512xf32> -> vector<8x512xf32>
    %290 = arith.addf %288, %289 : vector<8x512xf32>
    %291 = vector.broadcast %2 : vector<1x512xf32> to vector<8x512xf32>
    %292 = arith.addf %290, %291 : vector<8x512xf32>
    %293 = vector.extract_strided_slice %292 {offsets = [0, 0], sizes = [8, 128], strides = [1, 1]} : vector<8x512xf32> to vector<8x128xf32>
    %294 = arith.negf %293 : vector<8x128xf32>
    %295 = math.exp %294 : vector<8x128xf32>
    %cst_89 = arith.constant 1.000000e+00 : f32
    %296 = vector.broadcast %cst_89 : f32 to vector<8x128xf32>
    %297 = arith.addf %296, %295 : vector<8x128xf32>
    %298 = arith.divf %296, %297 : vector<8x128xf32>
    %299 = vector.extract_strided_slice %292 {offsets = [0, 128], sizes = [8, 128], strides = [1, 1]} : vector<8x512xf32> to vector<8x128xf32>
    %300 = arith.negf %299 : vector<8x128xf32>
    %301 = math.exp %300 : vector<8x128xf32>
    %cst_90 = arith.constant 1.000000e+00 : f32
    %302 = vector.broadcast %cst_90 : f32 to vector<8x128xf32>
    %303 = arith.addf %302, %301 : vector<8x128xf32>
    %304 = arith.divf %302, %303 : vector<8x128xf32>
    %305 = vector.extract_strided_slice %292 {offsets = [0, 256], sizes = [8, 128], strides = [1, 1]} : vector<8x512xf32> to vector<8x128xf32>
    %306 = math.tanh %305 : vector<8x128xf32>
    %307 = vector.extract_strided_slice %292 {offsets = [0, 384], sizes = [8, 128], strides = [1, 1]} : vector<8x512xf32> to vector<8x128xf32>
    %308 = arith.negf %307 : vector<8x128xf32>
    %309 = math.exp %308 : vector<8x128xf32>
    %cst_91 = arith.constant 1.000000e+00 : f32
    %310 = vector.broadcast %cst_91 : f32 to vector<8x128xf32>
    %311 = arith.addf %310, %309 : vector<8x128xf32>
    %312 = arith.divf %310, %311 : vector<8x128xf32>
    %313 = arith.mulf %304, %276 : vector<8x128xf32>
    %314 = arith.mulf %298, %306 : vector<8x128xf32>
    %315 = arith.addf %313, %314 : vector<8x128xf32>
    %316 = math.tanh %315 : vector<8x128xf32>
    %317 = arith.mulf %312, %316 : vector<8x128xf32>
    %cst_92 = arith.constant dense<0.000000e+00> : vector<8x2xf32>
    %318 = tpu.matmul %317, %3, %cst_92 {dimension_numbers = #tpu.dot_dimension_numbers<[1], [0], [0], [1], [0, 0, 1, 1], [], []>} : vector<8x128xf32>, vector<128x2xf32>, vector<8x2xf32> -> vector<8x2xf32>
    %319 = vector.broadcast %4 : vector<1x2xf32> to vector<8x2xf32>
    %320 = arith.addf %318, %319 : vector<8x2xf32>
    %c7 = arith.constant 7 : index
    %c0_93 = arith.constant 0 : index
    %c0_94 = arith.constant 0 : index
    %321 = vector.load %arg13[%c7, %c0_93, %c0_94] : memref<8x8x2xf32, #tpu.memory_space<vmem>>, vector<1x8x2xf32>
    %322 = vector.shape_cast %321 : vector<1x8x2xf32> to vector<8x2xf32>
    %323 = vector.shape_cast %320 : vector<8x2xf32> to vector<1x8x2xf32>
    tpu.vector_store %arg13[%c7, %c0_93, %c0_94], %323 {strides = array<i32>} : memref<8x8x2xf32, #tpu.memory_space<vmem>>, vector<1x8x2xf32>,
    %c0_95 = arith.constant 0 : index
    %c0_96 = arith.constant 0 : index
    %324 = vector.load %arg14[%c0_95, %c0_96] : memref<8x128xf32, #tpu.memory_space<vmem>>, vector<8x128xf32>
    tpu.vector_store %arg14[%c0_95, %c0_96], %317 {strides = array<i32>} : memref<8x128xf32, #tpu.memory_space<vmem>>, vector<8x128xf32>,
    return
  }
  func.func @transform_0(%arg0: i32) -> (i32, i32) {
    %c0_i32 = arith.constant 0 : i32
    %c0_i32_0 = arith.constant 0 : i32
    %c0_i32_1 = arith.constant 0 : i32
    return %c0_i32, %c0_i32_0 : i32, i32
  }
  func.func @transform_1(%arg0: i32) -> (i32, i32) {
    %c0_i32 = arith.constant 0 : i32
    %c0_i32_0 = arith.constant 0 : i32
    %c0_i32_1 = arith.constant 0 : i32
    return %c0_i32, %c0_i32_0 : i32, i32
  }
  func.func @transform_2(%arg0: i32) -> (i32, i32) {
    %c0_i32 = arith.constant 0 : i32
    %c0_i32_0 = arith.constant 0 : i32
    %c0_i32_1 = arith.constant 0 : i32
    return %c0_i32, %c0_i32_0 : i32, i32
  }
  func.func @transform_3(%arg0: i32) -> (i32, i32) {
    %c0_i32 = arith.constant 0 : i32
    %c0_i32_0 = arith.constant 0 : i32
    %c0_i32_1 = arith.constant 0 : i32
    return %c0_i32, %c0_i32_0 : i32, i32
  }
  func.func @transform_4(%arg0: i32) -> (i32, i32) {
    %c0_i32 = arith.constant 0 : i32
    %c0_i32_0 = arith.constant 0 : i32
    %c0_i32_1 = arith.constant 0 : i32
    return %c0_i32, %c0_i32_0 : i32, i32
  }
  func.func @transform_5(%arg0: i32) -> (i32, i32) {
    %c0_i32 = arith.constant 0 : i32
    %c0_i32_0 = arith.constant 0 : i32
    %c0_i32_1 = arith.constant 0 : i32
    return %c0_i32, %c0_i32_0 : i32, i32
  }
  func.func @transform_6(%arg0: i32) -> (i32, i32) {
    %c0_i32 = arith.constant 0 : i32
    %c0_i32_0 = arith.constant 0 : i32
    %c0_i32_1 = arith.constant 0 : i32
    return %c0_i32, %c0_i32_0 : i32, i32
  }
  func.func @transform_7(%arg0: i32) -> (i32, i32) {
    %c0_i32 = arith.constant 0 : i32
    %c0_i32_0 = arith.constant 0 : i32
    %c0_i32_1 = arith.constant 0 : i32
    return %c0_i32, %c0_i32_0 : i32, i32
  }
  func.func @transform_8(%arg0: i32) -> (i32, i32) {
    %c0_i32 = arith.constant 0 : i32
    %c0_i32_0 = arith.constant 0 : i32
    %c0_i32_1 = arith.constant 0 : i32
    return %c0_i32, %c0_i32_0 : i32, i32
  }
  func.func @transform_9(%arg0: i32) -> (i32, i32) {
    %c0_i32 = arith.constant 0 : i32
    %c0_i32_0 = arith.constant 0 : i32
    %c0_i32_1 = arith.constant 0 : i32
    return %c0_i32, %c0_i32_0 : i32, i32
  }
  func.func @transform_10(%arg0: i32) -> (i32, i32) {
    %c0_i32 = arith.constant 0 : i32
    %c0_i32_0 = arith.constant 0 : i32
    %c0_i32_1 = arith.constant 0 : i32
    return %c0_i32, %c0_i32_0 : i32, i32
  }
  func.func @transform_11(%arg0: i32) -> (i32, i32) {
    %c0_i32 = arith.constant 0 : i32
    %c0_i32_0 = arith.constant 0 : i32
    %c0_i32_1 = arith.constant 0 : i32
    return %c0_i32, %c0_i32_0 : i32, i32
  }
  func.func @transform_12(%arg0: i32) -> (i32, i32, i32) {
    %c0_i32 = arith.constant 0 : i32
    %c0_i32_0 = arith.constant 0 : i32
    %c0_i32_1 = arith.constant 0 : i32
    %c0_i32_2 = arith.constant 0 : i32
    return %c0_i32, %c0_i32_0, %c0_i32_1 : i32, i32, i32
  }
  func.func @transform_13(%arg0: i32) -> (i32, i32) {
    %c0_i32 = arith.constant 0 : i32
    %c0_i32_0 = arith.constant 0 : i32
    %c0_i32_1 = arith.constant 0 : i32
    return %c0_i32, %c0_i32_0 : i32, i32
  }
}

</mosaic_0001>

<bundles_post_ra>
// kernel: tpu_custom_call.1
= control target key start
LH: loop header
LB: loop body
LE: loop exit
PB: predicated region body
PF: predicated region fallthrough
CT: control target
= control target key end

     0   :  { %19 = vsyncpa [#allocation3], 0  ;;  %s7115_s0 = inlined_call_operand.vmem [shape: f32[8,2], index: 0, kind: input, shape index: {}]   ;;  %s7116_s1 = inlined_call_operand.vmem [shape: f32[8,128], index: 1, kind: input, shape index: {}]   ;;  %s7117_s2 = inlined_call_operand.vmem [shape: f32[8,128], index: 2, kind: input, shape index: {}]   ;;  %s7118_s3 = inlined_call_operand.vmem [shape: f32[2,32], index: 3, kind: input, shape index: {}]   ;;  %s7119_s4 = inlined_call_operand.vmem [shape: f32[1,32], index: 4, kind: input, shape index: {}]   ;;  %s7120_s5 = inlined_call_operand.vmem [shape: f32[32,512], index: 5, kind: input, shape index: {}]   ;;  %s7121_s6 = inlined_call_operand.hbm [shape: f32[128,512], index: 6, kind: input, shape index: {}]   ;;  %s7122_s7 = inlined_call_operand.vmem [shape: f32[1,512], index: 7, kind: input, shape index: {}]   ;;  %s7123_s8 = inlined_call_operand.vmem [shape: f32[128,2], index: 8, kind: input, shape index: {}]   ;;  %s7124_s9 = inlined_call_operand.vmem [shape: f32[1,2], index: 9, kind: input, shape index: {}]   ;;  %s7125_s10 = inlined_call_operand.vmem [shape: f32[128,32], index: 10, kind: input, shape index: {}]   ;;  %s7126_s11 = inlined_call_operand.vmem [shape: f32[1,32], index: 11, kind: input, shape index: {}]   ;;  %s7127_s12 = inlined_call_operand.vmem [shape: f32[8,8,2], index: 12, kind: output, shape index: {0}]   ;;  %s7128_s13 = inlined_call_operand.hbm [shape: f32[8,128], index: 13, kind: output, shape index: {1}]  }
   0x1   :  { %20 = vsyncpa [#allocation4], 0  ;;  %s5957_s25 = smov [#allocation2]   ;;  %s5909_s29 = scalar_lea.hbm %s7121_s6, 8192 }
   0x2   :  { %s38_s26 = sshll.u32 %s5957_s25, 4  ;;  %p5910_p0 = scmp.ne.s32.totalorder %s7121_s6, %s5909_s29  ;;  %s39_s26 = int_to_ptr.vmem [resolvable:$true] %s38_s26 }
   0x3   :  { %p5913_p1 = scmp.lt.u32.totalorder %s5909_s29, %s7121_s6 }
   0x5   :  { %p5915_p2 = pnand %p5913_p1, %p5910_p0 }
   0x7   :  { %5918 = shalt.err (!%p5915_p2)
}
   0x8   :  { %s5919_s17 = scalar_lea.vmem %s39_s26, 8192  ;;  %p5924_p4 = scmp.lt.s32.totalorder %s39_s26, %s39_s26 }
   0x9   :  { %p5920_p3 = scmp.ne.s32.totalorder %s39_s26, %s5919_s17  ;;  %p5925_p5 = scmp.lt.s32.totalorder %s5919_s17, %s5919_s17 }
   0xb   :  { %p5926_p6 = por %p5925_p5, %p5924_p4 }
   0xd   :  { %p5927_p7 = pnand %p5926_p6, %p5920_p3 }
   0xf   :  { %5930 = shalt.err (!%p5927_p7)
}
  0x10   :  { %s5958_s18 = smov 512   ;;  %s5959_s19 = smov 32  }
  0x11   :  { %44 = dma.hbm_to_vmem [thread:$0]  %s7121_s6, 8192, %s39_s26, [#allocation3], %s5958_s18, %s5958_s18, %s5959_s19  }
  0x12   :  { %5953 = dma.done.wait [#allocation3], 8192  }
  0x13   :  { %5954 = vsyncadd [#allocation3], 4294959104  ;;  %v7129_v0 = vmov 0.0   ;;  %vm5961_vm0 = vmmov 0   ;;  %vm186_vm1 = vcmask 1041408   ;;  %vm182_vm2 = vcmask 15360  }
  0x14   :  { %4210 = vmatprep.subr.mxu0 %v7129_v0  ;;  %4212 = vmatprep.mubr.msk.f32.mxu0 %vm5961_vm0, %v7129_v0  ;;  %v174_v1 = vld [vmem:[%s7118_s3] sm:$0x3]  ;;  %v77_v3 = vld [vmem:[#allocation2 + $0x18] sm:$0xff]  ;;  %v76_v5 = vld [vmem:[#allocation2 + $0x10] sm:$0xff]  ;;  %vm404_vm3 = vcmask 261120   ;;  %s5963_s30 = smov [#allocation5]  }
  0x15   :  { %326 = vmatprep.mubr.f32.mxu1 %v7129_v0  ;;  %v173_v2 = vld [vmem:[%s7115_s0] sm:$0xff]  ;;  %4211 = vmatpush3.msk.msra.mxu0 %vm186_vm1, %v174_v1  ;;  %v81_v4 = vld [vmem:[#allocation2 + $0x38] sm:$0xff]  ;;  %v80_v6 = vld [vmem:[#allocation2 + $0x30] sm:$0xff]  ;;  %s3890_s14 = sshll.u32 %s5963_s30, 4  ;;  %s3891_s14 = int_to_ptr.vmem [resolvable:$true] %s3890_s14 }
  0x16   :  { %4213 = vmatmul.mubr.msk.f32.vlgmr.msra.gmra.mrb[0].mxu0 %vm182_vm2, %v173_v2  ;;  %v6057_v7 = vpack.c.bf16 %v81_v4, %v77_v3  ;;  %v6059_v8 = vpack.c.bf16 %v80_v6, %v76_v5  ;;  %v85_v9 = vld [vmem:[#allocation2 + $0x58] sm:$0xff]  ;;  %v84_v11 = vld [vmem:[#allocation2 + $0x50] sm:$0xff]  ;;  %v75_v14 = vld [vmem:[#allocation2 + $0x8] sm:$0xff]  ;;  %s5931_s15 = scalar_lea.vmem %s3891_s14, 128  ;;  %p5936_p9 = scmp.lt.s32.totalorder %s3891_s14, %s3891_s14 }
  0x17   :  { %v89_v10 = vld [vmem:[#allocation2 + $0x78] sm:$0xff]  ;;  %v88_v13 = vld [vmem:[#allocation2 + $0x70] sm:$0xff]  ;;  %v79_v15 = vld [vmem:[#allocation2 + $0x28] sm:$0xff]  ;;  %397 = vmatprep.mubr.f32.mxu0 %v7129_v0  ;;  %p5932_p8 = scmp.ne.s32.totalorder %s3891_s14, %s5931_s15  ;;  %p5937_p10 = scmp.lt.s32.totalorder %s5931_s15, %s5931_s15 }
  0x18   :  { %7178 = vst [vmem:[#allocation8_spill] sm:$0xff] %v6057_v7  ;;  %v6061_v12 = vpack.c.bf16 %v89_v10, %v85_v9  ;;  %4773 = vmatprep.subr.bf16.mxu0 %v6057_v7  ;;  %v6065_v16 = vpack.c.bf16 %v79_v15, %v75_v14  ;;  %v93_v17 = vld [vmem:[#allocation2 + $0x98] sm:$0xff]  ;;  %v74_v19 = vld [vmem:[#allocation2] sm:$0xff]  ;;  %v6068_v20 = vpack.c.bf16 %v88_v13, %v84_v11  ;;  %v92_v22 = vld [vmem:[#allocation2 + $0x90] sm:$0xff] }
  0x19   :  { %v97_v18 = vld [vmem:[#allocation2 + $0xb8] sm:$0xff]  ;;  %4775 = vmatpush1.bf16.msra.mxu0 %v6059_v8  ;;  %v78_v21 = vld [vmem:[#allocation2 + $0x20] sm:$0xff]  ;;  %v96_v23 = vld [vmem:[#allocation2 + $0xb0] sm:$0xff]  ;;  %p5938_p11 = por %p5937_p10, %p5936_p9 }
  0x1a   :  { %7179 = vst [vmem:[#allocation9_spill] sm:$0xff] %v6065_v16  ;;  %4777 = vmatprep.subr.bf16.mxu0 %v6061_v12  ;;  %4741 = vmatprep.subr.bf16.mxu1 %v6065_v16  ;;  %v6072_v24 = vpack.c.bf16 %v97_v18, %v93_v17  ;;  %v6074_v25 = vpack.c.bf16 %v78_v21, %v74_v19  ;;  %v83_v26 = vld [vmem:[#allocation2 + $0x48] sm:$0xff]  ;;  %v101_v28 = vld [vmem:[#allocation2 + $0xd8] sm:$0xff]  ;;  %v82_v31 = vld [vmem:[#allocation2 + $0x40] sm:$0xff] }
  0x1b   :  { %v87_v27 = vld [vmem:[#allocation2 + $0x68] sm:$0xff]  ;;  %v105_v30 = vld [vmem:[#allocation2 + $0xf8] sm:$0xff]  ;;  %v86_v32 = vld [vmem:[#allocation2 + $0x60] sm:$0xff]  ;;  %v6082_v35 = vpack.c.bf16 %v96_v23, %v92_v22  ;;  %p5939_p12 = pnand %p5938_p11, %p5932_p8 }
  0x1c   :  { %v6076_v29 = vpack.c.bf16 %v87_v27, %v83_v26  ;;  %4743 = vmatpush1.bf16.msra.mxu1 %v6074_v25  ;;  %v6079_v33 = vpack.c.bf16 %v86_v32, %v82_v31  ;;  %v91_v34 = vld [vmem:[#allocation2 + $0x88] sm:$0xff]  ;;  %v100_v36 = vld [vmem:[#allocation2 + $0xd0] sm:$0xff]  ;;  %v6086_v39 = vpack.c.bf16 %v105_v30, %v101_v28  ;;  %v109_v41 = vld [vmem:[#allocation2 + $0x118] sm:$0xff] }
  0x1d   :  { %4779 = vmatpush1.bf16.msra.mxu0 %v6068_v20  ;;  %v104_v37 = vld [vmem:[#allocation2 + $0xf0] sm:$0xff]  ;;  %v95_v38 = vld [vmem:[#allocation2 + $0xa8] sm:$0xff]  ;;  %v90_v42 = vld [vmem:[#allocation2 + $0x80] sm:$0xff] }
  0x1e   :  { %4745 = vmatprep.subr.bf16.mxu1 %v6076_v29  ;;  %4781 = vmatprep.subr.bf16.mxu0 %v6072_v24  ;;  %v6088_v40 = vpack.c.bf16 %v95_v38, %v91_v34  ;;  %v94_v43 = vld [vmem:[#allocation2 + $0xa0] sm:$0xff]  ;;  %v113_v44 = vld [vmem:[#allocation2 + $0x138] sm:$0xff]  ;;  %v99_v45 = vld [vmem:[#allocation2 + $0xc8] sm:$0xff]  ;;  %v6094_v48 = vpack.c.bf16 %v104_v37, %v100_v36 }
  0x1f   :  { %v103_v46 = vld [vmem:[#allocation2 + $0xe8] sm:$0xff]  ;;  %v6091_v47 = vpack.c.bf16 %v94_v43, %v90_v42  ;;  %v108_v49 = vld [vmem:[#allocation2 + $0x110] sm:$0xff]  ;;  %v98_v51 = vld [vmem:[#allocation2 + $0xc0] sm:$0xff]  ;;  %v6100_v53 = vpack.c.bf16 %v113_v44, %v109_v41 }
  0x20   :  { %4747 = vmatpush1.bf16.msra.mxu1 %v6079_v33  ;;  %v6097_v50 = vpack.c.bf16 %v103_v46, %v99_v45  ;;  %v102_v52 = vld [vmem:[#allocation2 + $0xe0] sm:$0xff]  ;;  %v112_v54 = vld [vmem:[#allocation2 + $0x130] sm:$0xff]  ;;  %v107_v55 = vld [vmem:[#allocation2 + $0x108] sm:$0xff] }
  0x21   :  { %4783 = vmatpush1.bf16.msra.mxu0 %v6082_v35  ;;  %4749 = vmatprep.subr.bf16.mxu1 %v6088_v40  ;;  %v111_v56 = vld [vmem:[#allocation2 + $0x128] sm:$0xff]  ;;  %v117_v57 = vld [vmem:[#allocation2 + $0x158] sm:$0xff]  ;;  %v6103_v59 = vpack.c.bf16 %v102_v52, %v98_v51  ;;  %v6106_v60 = vpack.c.bf16 %v112_v54, %v108_v49  ;;  %v116_v61 = vld [vmem:[#allocation2 + $0x150] sm:$0xff] }
  0x22   :  { %4785 = vmatprep.subr.bf16.mxu0 %v6086_v39  ;;  %v121_v58 = vld [vmem:[#allocation2 + $0x178] sm:$0xff]  ;;  %v6109_v62 = vpack.c.bf16 %v111_v56, %v107_v55  ;;  %v106_v63 = vld [vmem:[#allocation2 + $0x100] sm:$0xff]  ;;  %v120_v3 = vld [vmem:[#allocation2 + $0x170] sm:$0xff] }
  0x23   :  { %v110_v1 = vld [vmem:[#allocation2 + $0x120] sm:$0xff]  ;;  %v6112_v2 = vpack.c.bf16 %v121_v58, %v117_v57  ;;  %v115_v4 = vld [vmem:[#allocation2 + $0x148] sm:$0xff]  ;;  %v125_v6 = vld [vmem:[#allocation2 + $0x198] sm:$0xff]  ;;  %v6118_v11 = vpack.c.bf16 %v120_v3, %v116_v61 }
  0x24   :  { %4751 = vmatpush1.bf16.msra.mxu1 %v6091_v47  ;;  %v119_v5 = vld [vmem:[#allocation2 + $0x168] sm:$0xff]  ;;  %v129_v9 = vld [vmem:[#allocation2 + $0x1b8] sm:$0xff]  ;;  %v6115_v10 = vpack.c.bf16 %v110_v1, %v106_v63  ;;  %v124_v13 = vld [vmem:[#allocation2 + $0x190] sm:$0xff] }
  0x25   :  { %4787 = vmatpush1.bf16.msra.mxu0 %v6094_v48  ;;  %4753 = vmatprep.subr.bf16.mxu1 %v6097_v50  ;;  %v6121_v14 = vpack.c.bf16 %v119_v5, %v115_v4  ;;  %v114_v15 = vld [vmem:[#allocation2 + $0x140] sm:$0xff]  ;;  %v6124_v18 = vpack.c.bf16 %v129_v9, %v125_v6  ;;  %v128_v19 = vld [vmem:[#allocation2 + $0x1b0] sm:$0xff]  ;;  %v123_v21 = vld [vmem:[#allocation2 + $0x188] sm:$0xff] }
  0x26   :  { %4789 = vmatprep.subr.bf16.mxu0 %v6100_v53  ;;  %v118_v17 = vld [vmem:[#allocation2 + $0x160] sm:$0xff]  ;;  %v127_v22 = vld [vmem:[#allocation2 + $0x1a8] sm:$0xff]  ;;  %v133_v23 = vld [vmem:[#allocation2 + $0x1d8] sm:$0xff]  ;;  %v6130_v28 = vpack.c.bf16 %v128_v19, %v124_v13 }
  0x27   :  { %v137_v26 = vld [vmem:[#allocation2 + $0x1f8] sm:$0xff]  ;;  %v6127_v27 = vpack.c.bf16 %v118_v17, %v114_v15  ;;  %v132_v30 = vld [vmem:[#allocation2 + $0x1d0] sm:$0xff]  ;;  %v6133_v31 = vpack.c.bf16 %v127_v22, %v123_v21  ;;  %v122_v32 = vld [vmem:[#allocation2 + $0x180] sm:$0xff] }
  0x28   :  { %4755 = vmatpush1.bf16.msra.mxu1 %v6103_v59  ;;  %v126_v34 = vld [vmem:[#allocation2 + $0x1a0] sm:$0xff]  ;;  %v6136_v36 = vpack.c.bf16 %v137_v26, %v133_v23  ;;  %v136_v37 = vld [vmem:[#allocation2 + $0x1f0] sm:$0xff]  ;;  %v131_v38 = vld [vmem:[#allocation2 + $0x1c8] sm:$0xff] }
  0x29   :  { %4791 = vmatpush1.bf16.msra.mxu0 %v6106_v60  ;;  %4757 = vmatprep.subr.bf16.mxu1 %v6109_v62  ;;  %v135_v41 = vld [vmem:[#allocation2 + $0x1e8] sm:$0xff]  ;;  %v6145_v44 = vpack.c.bf16 %v126_v34, %v122_v32  ;;  %v6148_v45 = vpack.c.bf16 %v136_v37, %v132_v30  ;;  %v130_v49 = vld [vmem:[#allocation2 + $0x1c0] sm:$0xff]  ;;  %v61_v6 = vld [vmem:[%s7120_s5 + $0x18] sm:$0xff] }
  0x2a   :  { %4793 = vmatprep.subr.bf16.mxu0 %v6112_v2  ;;  %v59_v42 = vld [vmem:[%s7120_s5 + $0x8] sm:$0xff]  ;;  %v6151_v46 = vpack.c.bf16 %v135_v41, %v131_v38  ;;  %v134_v51 = vld [vmem:[#allocation2 + $0x1e0] sm:$0xff]  ;;  %v65_v9 = vld [vmem:[%s7120_s5 + $0x38] sm:$0xff] }
  0x2b   :  { %v63_v43 = vld [vmem:[%s7120_s5 + $0x28] sm:$0xff]  ;;  %v58_v54 = vld [vmem:[%s7120_s5] sm:$0xff]  ;;  %v6169_v58 = vpack.c.bf16 %v134_v51, %v130_v49  ;;  %v6202_v13 = vpack.c.bf16 %v65_v9, %v61_v6  ;;  %v60_v15 = vld [vmem:[%s7120_s5 + $0x10] sm:$0xff] }
  0x2c   :  { %4759 = vmatpush1.bf16.msra.mxu1 %v6115_v10  ;;  %v6154_v52 = vpack.c.bf16 %v63_v43, %v59_v42  ;;  %v62_v55 = vld [vmem:[%s7120_s5 + $0x20] sm:$0xff]  ;;  %v67_v56 = vld [vmem:[%s7120_s5 + $0x48] sm:$0xff]  ;;  %v64_v17 = vld [vmem:[%s7120_s5 + $0x30] sm:$0xff] }
  0x2d   :  { %4795 = vmatpush1.bf16.msra.mxu0 %v6118_v11  ;;  %4761 = vmatprep.subr.bf16.mxu1 %v6121_v14  ;;  %v71_v57 = vld [vmem:[%s7120_s5 + $0x68] sm:$0xff]  ;;  %v260_v61 = vld [vmem:[%s7116_s1] sm:$0xff]  ;;  %v6175_v63 = vpack.c.bf16 %v62_v55, %v58_v54  ;;  %v69_v21 = vld [vmem:[%s7120_s5 + $0x58] sm:$0xff]  ;;  %v6220_v26 = vpack.c.bf16 %v64_v17, %v60_v15 }
  0x2e   :  { %4797 = vmatprep.subr.bf16.mxu0 %v6124_v18  ;;  %v6179_v1 = vpack.c.bf16 %v71_v57, %v67_v56  ;;  %v66_v3 = vld [vmem:[%s7120_s5 + $0x40] sm:$0xff]  ;;  %v73_v22 = vld [vmem:[%s7120_s5 + $0x78] sm:$0xff]  ;;  %v68_v37 = vld [vmem:[%s7120_s5 + $0x50] sm:$0xff]  ;;  %v7135_v57 = vmov 0.0|0.0  }
  0x2f   :  { %v70_v4 = vld [vmem:[%s7120_s5 + $0x60] sm:$0xff]  ;;  %7180 = vst [vmem:[#allocation10_spill] sm:$0xff] %v6220_v26  ;;  %v6222_v34 = vpack.c.bf16 %v73_v22, %v69_v21  ;;  %v72_v38 = vld [vmem:[%s7120_s5 + $0x70] sm:$0xff]  ;;  %v140_v51 = vld [vmem:[%s7123_s8 + $0x8] sm:$0xff] }
  0x30   :  { %4763 = vmatpush1.bf16.msra.mxu1 %v6127_v27  ;;  %v6189_v5 = vpack.c.bf16 %v70_v4, %v66_v3  ;;  %v3901_v19 = vld [vmem:[%s7119_s4] ss:$0 sm:$0xff]  ;;  %v6232_v41 = vpack.c.bf16 %v72_v38, %v68_v37  ;;  %v157_v56 = vld [vmem:[%s7125_s10 + $0x8] sm:$0xff]  ;;  %v141_v3 = vld [vmem:[%s7123_s8 + $0x10] sm:$0xff] }
  0x31   :  { %4799 = vmatpush1.bf16.msra.mxu0 %v6130_v28  ;;  %4765 = vmatprep.subr.bf16.mxu1 %v6133_v31  ;;  %7181 = vst [vmem:[#allocation11_spill] sm:$0xff] %v6222_v34  ;;  %v139_v49 = vld [vmem:[%s7123_s8] sm:$0xff]  ;;  %v142_v4 = vld [vmem:[%s7123_s8 + $0x18] sm:$0xff]  ;;  %v158_v6 = vld [vmem:[%s7125_s10 + $0x10] sm:$0xff] }
  0x32   :  { %4801 = vmatprep.subr.bf16.mxu0 %v6136_v36  ;;  %7182 = vst [vmem:[#allocation12_spill] sm:$0xff] %v6232_v41  ;;  %v156_v54 = vld [vmem:[%s7125_s10] sm:$0xff]  ;;  %v6253_v55 = vpack.c.bf16 %v140_v51, %v139_v49  ;;  %v6275_v9 = vpack.c.bf16 %v142_v4, %v141_v3  ;;  %v159_v15 = vld [vmem:[%s7125_s10 + $0x18] sm:$0xff]  ;;  %v144_v21 = vld [vmem:[%s7123_s8 + $0x28] sm:$0xff] }
  0x33   :  { %v6280_v17 = vpack.c.bf16 %v159_v15, %v158_v6  ;;  %v160_v22 = vld [vmem:[%s7125_s10 + $0x20] sm:$0xff]  ;;  %v145_v37 = vld [vmem:[%s7123_s8 + $0x30] sm:$0xff]  ;;  %v146_v38 = vld [vmem:[%s7123_s8 + $0x38] sm:$0xff] }
  0x34   :  { %4767 = vmatpush1.bf16.msra.mxu1 %v6145_v44  ;;  %7183 = vst [vmem:[#allocation13_spill] sm:$0xff] %v6253_v55  ;;  %7185 = vst [vmem:[#allocation15_spill] sm:$0xff] %v6275_v9  ;;  %v162_v49 = vld [vmem:[%s7125_s10 + $0x30] sm:$0xff]  ;;  %v6315_v51 = vpack.c.bf16 %v146_v38, %v145_v37  ;;  %v147_v3 = vld [vmem:[%s7123_s8 + $0x40] sm:$0xff] }
  0x35   :  { %4803 = vmatpush1.bf16.msra.mxu0 %v6148_v45  ;;  %4769 = vmatprep.subr.bf16.mxu1 %v6151_v46  ;;  %7186 = vst [vmem:[#allocation16_spill] sm:$0xff] %v6280_v17  ;;  %v148_v4 = vld [vmem:[%s7123_s8 + $0x48] sm:$0xff]  ;;  %v164_v6 = vld [vmem:[%s7125_s10 + $0x40] sm:$0xff]  ;;  %v166_v37 = vld [vmem:[%s7125_s10 + $0x50] sm:$0xff] }
  0x36   :  { %4805 = vmatprep.subr.bf16.mxu0 %v6154_v52  ;;  %7189 = vst [vmem:[#allocation19_spill] sm:$0xff] %v6315_v51  ;;  %v6335_v15 = vpack.c.bf16 %v148_v4, %v147_v3  ;;  %v152_v3 = vld [vmem:[%s7123_s8 + $0x68] sm:$0xff] }
  0x38   :  { %398 = vmatmul.mubr.f32.vlgmr.msra.gmra.mrb[2].mxu0 %v260_v61  ;;  %4771 = vmatpush1.bf16.msra.mxu1 %v6169_v58  ;;  %7191 = vst [vmem:[#allocation21_spill] sm:$0xff] %v6335_v15 }
  0x39   :  { %4807 = vmatpush1.bf16.msra.mxu0 %v6175_v63  ;;  %472 = vmatprep.mubr.f32.mxu0 %v7129_v0 }
  0x3a   :  { %4809 = vmatprep.subr.bf16.mxu0 %v6179_v1  ;;  %4820 = vmatprep.subr.bf16.mxu1 %v7135_v57 }
  0x3b   :  { %327 = vmatmul.mubr.f32.vlgmr.msra.gmra.mrb[0].mxu1 %v260_v61  ;;  %v6260_v61 = vpack.c.bf16 %v157_v56, %v156_v54  ;;  %v163_v54 = vld [vmem:[%s7125_s10 + $0x38] sm:$0xff] }
  0x3c   :  { %4247 = vmatprep.mubr.msk.f32.mxu1 %vm5961_vm0, %v7129_v0  ;;  %4822 = vmatpush3.bf16.msra.mxu1 %v6253_v55  ;;  %v6320_v56 = vpack.c.bf16 %v163_v54, %v162_v49  ;;  %v167_v49 = vld [vmem:[%s7125_s10 + $0x58] sm:$0xff]  ;;  %v151_v54 = vld [vmem:[%s7123_s8 + $0x60] sm:$0xff] }
  0x3d   :  { %4811 = vmatpush1.bf16.msra.mxu0 %v6189_v5  ;;  %7184 = vst [vmem:[#allocation14_spill] sm:$0xff] %v6260_v61  ;;  %4823 = vmatprep.subr.bf16.mxu1 %v7135_v57  ;;  %v6366_v4 = vpack.c.bf16 %v167_v49, %v166_v37  ;;  %v153_v37 = vld [vmem:[%s7123_s8 + $0x70] sm:$0xff]  ;;  %v154_v49 = vld [vmem:[%s7123_s8 + $0x78] sm:$0xff] }
  0x3e   :  { %4813 = vmatprep.subr.bf16.mxu0 %v6202_v13  ;;  %7190 = vst [vmem:[#allocation20_spill] sm:$0xff] %v6320_v56 }
  0x3f   :  { %7194 = vst [vmem:[#allocation24_spill] sm:$0xff] %v6366_v4 }
  0x40   :  { %4825 = vmatpush3.bf16.msra.mxu1 %v6275_v9 }
  0x41   :  { %4826 = vmatprep.subr.bf16.mxu1 %v7135_v57 }
  0xe9   :  { %v256_v23 = vpop.f32.mrb[0].mxu0 }
  0xea   :  { %v257_v30 = vadd.f32 %v3901_v19, %v256_v23  ;;  %v4214_v32 = vpop.f32.mrb[1].mxu0  ;;  %v143_v19 = vld [vmem:[%s7123_s8 + $0x20] sm:$0xff] }
  0xeb   :  { %v6295_v23 = vpack.c.bf16 %v144_v21, %v143_v19  ;;  %v165_v19 = vld [vmem:[%s7125_s10 + $0x48] sm:$0xff] }
  0xec   :  { %3904 = vmatmul.mubr.msk.f32.vlgmr.msra.gmra.mrb[4].mxu0 %vm404_vm3, %v257_v30  ;;  %v6340_v21 = vpack.c.bf16 %v165_v19, %v164_v6  ;;  %v168_v6 = vld [vmem:[%s7125_s10 + $0x60] sm:$0xff]  ;;  %v169_v19 = vld [vmem:[%s7125_s10 + $0x68] sm:$0xff] }
  0xed   :  { %4815 = vmatpush1.bf16.msra.mxu0 %v6220_v26  ;;  %543 = vmatprep.mubr.f32.mxu0 %v7129_v0  ;;  %7187 = vst [vmem:[#allocation17_spill] sm:$0xff] %v6295_v23 }
  0xee   :  { %4817 = vmatprep.subr.bf16.mxu0 %v6222_v34  ;;  %4828 = vmatpush3.bf16.msra.mxu1 %v6295_v23  ;;  %7192 = vst [vmem:[#allocation22_spill] sm:$0xff] %v6340_v21 }
  0xef   :  { %4829 = vmatprep.subr.bf16.mxu1 %v7135_v57 }
  0xf1   :  { %4819 = vmatpush1.bf16.msra.mxu0 %v6232_v41 }
  0xf2   :  { %4844 = vmatprep.subr.bf16.mxu0 %v7135_v57  ;;  %4831 = vmatpush3.bf16.msra.mxu1 %v6315_v51 }
  0xf3   :  { %4832 = vmatprep.subr.bf16.mxu1 %v7135_v57 }
  0xf4   :  { %3905 = vmatmul.mubr.msk.f32.vlgmr.msra.gmra.mrb[2].mxu0 %vm404_vm3, %v257_v30  ;;  %v161_v30 = vld [vmem:[%s7125_s10 + $0x28] sm:$0xff] }
  0xf5   :  { %4282 = vmatprep.mubr.msk.f32.mxu0 %vm5961_vm0, %v7129_v0  ;;  %4846 = vmatpush3.bf16.msra.mxu0 %v6260_v61  ;;  %v6300_v32 = vpack.c.bf16 %v161_v30, %v160_v22  ;;  %v149_v22 = vld [vmem:[%s7123_s8 + $0x50] sm:$0xff]  ;;  %v150_v30 = vld [vmem:[%s7123_s8 + $0x58] sm:$0xff]  ;;  %v551_v0 = vlaneseq }
  0xf6   :  { %4847 = vmatprep.subr.bf16.mxu0 %v7135_v57  ;;  %4834 = vmatpush3.bf16.msra.mxu1 %v6335_v15  ;;  %v6355_v38 = vpack.c.bf16 %v150_v30, %v149_v22  ;;  %v6375_v22 = vpack.c.bf16 %v152_v3, %v151_v54  ;;  %v6379_v30 = vpack.c.bf16 %v169_v19, %v168_v6  ;;  %v170_v54 = vld [vmem:[%s7125_s10 + $0x70] sm:$0xff]  ;;  %v171_v3 = vld [vmem:[%s7125_s10 + $0x78] sm:$0xff] }
  0xf7   :  { %7188 = vst [vmem:[#allocation18_spill] sm:$0xff] %v6300_v32  ;;  %4835 = vmatprep.subr.bf16.mxu1 %v7135_v57  ;;  %v6395_v6 = vpack.c.bf16 %v154_v49, %v153_v37  ;;  %v6399_v19 = vpack.c.bf16 %v171_v3, %v170_v54  ;;  %v138_v49 = vld [vmem:[%s7122_s7] sm:$0xf] }
  0xf8   :  { %7193 = vst [vmem:[#allocation23_spill] sm:$0xff] %v6355_v38  ;;  %7195 = vst [vmem:[#allocation25_spill] sm:$0xff] %v6375_v22 }
  0xf9   :  { %4849 = vmatpush3.bf16.msra.mxu0 %v6280_v17  ;;  %7196 = vst [vmem:[#allocation26_spill] sm:$0xff] %v6379_v30  ;;  %7197 = vst [vmem:[#allocation27_spill] sm:$0xff] %v6395_v6 }
  0xfa   :  { %4850 = vmatprep.subr.bf16.mxu0 %v7135_v57  ;;  %4837 = vmatpush3.bf16.msra.mxu1 %v6355_v38  ;;  %7198 = vst [vmem:[#allocation28_spill] sm:$0xff] %v6399_v19 }
  0xfb   :  { %4838 = vmatprep.subr.bf16.mxu1 %v7135_v57 }
  0xfd   :  { %4852 = vmatpush3.bf16.msra.mxu0 %v6300_v32 }
  0xfe   :  { %4853 = vmatprep.subr.bf16.mxu0 %v7135_v57  ;;  %4840 = vmatpush3.bf16.msra.mxu1 %v6375_v22 }
  0xff   :  { %4841 = vmatprep.subr.bf16.mxu1 %v7135_v57 }
 0x101   :  { %4855 = vmatpush3.bf16.msra.mxu0 %v6320_v56 }
 0x102   :  { %4856 = vmatprep.subr.bf16.mxu0 %v7135_v57  ;;  %4843 = vmatpush3.bf16.msra.mxu1 %v6395_v6 }
 0x103   :  { %4869 = vmatprep.subr.bf16.mxu1 %v6065_v16 }
 0x105   :  { %4858 = vmatpush3.bf16.msra.mxu0 %v6340_v21 }
 0x106   :  { %4859 = vmatprep.subr.bf16.mxu0 %v7135_v57 }
 0x109   :  { %4861 = vmatpush3.bf16.msra.mxu0 %v6366_v4  ;;  %v552_v4 = vshrl.u32 %v551_v0, 7 }
 0x10a   :  { %4862 = vmatprep.subr.bf16.mxu0 %v7135_v57 }
 0x10b   :  { %v553_v37 = vsub.s32 0, %v552_v4  ;;  %v565_v32 = vsub.s32 3, %v552_v4 }
 0x10d   :  { %4864 = vmatpush3.bf16.msra.mxu0 %v6379_v30  ;;  %v557_v30 = vsub.s32 1, %v552_v4  ;;  %v6409_v54 = vrot.slane %v138_v49, %v553_v37  ;;  %v6417_v41 = vrot.slane %v138_v49, %v565_v32  ;;  %v561_v37 = vsub.s32 2, %v552_v4 }
 0x10e   :  { %v6240_v42 = vpop.f32.mrb[0].mxu1  ;;  %4865 = vmatprep.subr.bf16.mxu0 %v7135_v57 }
 0x10f   :  { %v6242_v43 = vpop.f32.mrb[1].mxu1  ;;  %7199 = vst [vmem:[#allocation29_spill] sm:$0xff] %v6409_v54  ;;  %v6411_v57 = vrot.slane %v138_v49, %v557_v30 }
 0x111   :  { %4867 = vmatpush3.bf16.msra.mxu0 %v6399_v19 }
 0x112   :  { %4901 = vmatprep.subr.bf16.mxu0 %v6057_v7 }
 0x1bf   :  { %v474_v3 = vpop.f32.mrb[4].mxu0 }
 0x1c0   :  { %v475_v21 = vadd.f32 %v474_v3, %v6240_v42  ;;  %v476_v19 = vpop.f32.mrb[5].mxu0  ;;  %v6420_v42 = vrot.slane %v138_v49, %v561_v37 }
 0x1c1   :  { %v477_v56 = vadd.f32 %v476_v19, %v6242_v43 }
 0x1c2   :  { %v571_v7 = vadd.f32 %v6409_v54, %v475_v21 }
 0x1c3   :  { %v572_v0 = vadd.f32 %v6411_v57, %v477_v56 }
 0x1c4   :  { %v3906_v17 = vmul.f32 -1.442695, %v571_v7 }
 0x1c5   :  { %v3907_v61 = vmul.f32 -1.442695, %v572_v0 }
 0x1c6   :  { %5779 = vpow2.f32 %v3906_v17 }
 0x1c7   :  { %5781 = vpow2.f32 %v3907_v61  ;;  %v545_v34 = vpop.f32.mrb[2].mxu0  ;;  %v261_v61 = vld [vmem:[%s7117_s2] sm:$0xff] }
 0x1c8   :  { %v547_v30 = vpop.f32.mrb[3].mxu0  ;;  %v573_v43 = vadd.f32 %v6420_v42, %v545_v34 }
 0x1c9   :  { %v574_v26 = vadd.f32 %v6417_v41, %v547_v30 }
 0x1cb   :  { %v3908_v3 = vmul.f32 -1.442695, %v574_v26 }
 0x1cd   :  { %5783 = vpow2.f32 %v3908_v3  ;;  %v7200_v3 = vmov 0.0  }
 0x1ce   :  { %5785 = vtanh.f32 %v573_v43  ;;  %v7201_v43 = vmov 0.0|0.0  }
 0x1d0   :  { %v5780_v19 = vpop.eup %5779 }
 0x1d1   :  { %v5782_v21 = vpop.eup %5781  ;;  %v578_v54 = vadd.f32 1.0, %v5780_v19  ;;  %v6489_v19 = vld [vmem:[%s7124_s9] ss:$0 sm:$0xff] }
 0x1d2   :  { %v584_v7 = vadd.f32 1.0, %v5782_v21  ;;  %v6494_v21 = vld [vmem:[%s7126_s11] ss:$0 sm:$0xff] }
 0x1d3   :  { %5787 = vrcp.f32 %v578_v54 }
 0x1d4   :  { %5789 = vrcp.f32 %v584_v7 }
 0x1d7   :  { %v5784_v17 = vpop.eup %5783 }
 0x1d8   :  { %v5786_v32 = vpop.eup %5785  ;;  %v591_v26 = vadd.f32 1.0, %v5784_v17 }
 0x1da   :  { %5791 = vrcp.f32 %v591_v26  ;;  %v7203_v26 = vld [vmem:[#allocation11_spill] sm:$0xff] }
 0x1dd   :  { %v5788_v56 = vpop.eup %5787 }
 0x1de   :  { %v5790_v4 = vpop.eup %5789  ;;  %v595_v49 = vmul.f32 %v5788_v56, %v5786_v32 }
 0x1df   :  { %v594_v0 = vmul.f32 %v5790_v4, %v261_v61 }
 0x1e1   :  { %v6426_v34 = vadd.f32 %v595_v49, %v594_v0  ;;  %v7202_v49 = vld [vmem:[#allocation10_spill] sm:$0xff]  ;;  %v7204_v0 = vld [vmem:[#allocation12_spill] sm:$0xff] }
 0x1e3   :  { %5793 = vtanh.f32 %v6426_v34 }
 0x1e4   :  { %v5792_v37 = vpop.eup %5791 }
 0x1ed   :  { %v5794_v30 = vpop.eup %5793 }
 0x1ee   :  { %v598_v54 = vmul.f32 %v5794_v30, %v5792_v37  ;;  %v7205_v37 = vld [vmem:[#allocation14_spill] sm:$0xff]  ;;  %v7206_v30 = vld [vmem:[#allocation16_spill] sm:$0xff] }
 0x1f0   :  { %4248 = vmatmul.mubr.f32.vlgmr.msra.gmra.mrb[2].mxu1 %v598_v54  ;;  %4283 = vmatmul.mubr.f32.vlgmr.msra.gmra.mrb[6].mxu0 %v598_v54 }
 0x1f1   :  { %4871 = vmatpush1.bf16.msra.mxu1 %v6074_v25  ;;  %4903 = vmatpush1.bf16.msra.mxu0 %v6059_v8 }
 0x1f2   :  { %4873 = vmatprep.subr.bf16.mxu1 %v6076_v29  ;;  %4905 = vmatprep.subr.bf16.mxu0 %v6061_v12 }
 0x1f3   :  { %816 = vmatprep.mubr.f32.mxu1 %v7200_v3  ;;  %887 = vmatprep.mubr.f32.mxu0 %v7200_v3 }
 0x1f5   :  { %4875 = vmatpush1.bf16.msra.mxu1 %v6079_v33  ;;  %4907 = vmatpush1.bf16.msra.mxu0 %v6068_v20 }
 0x1f6   :  { %4877 = vmatprep.subr.bf16.mxu1 %v6088_v40  ;;  %4909 = vmatprep.subr.bf16.mxu0 %v6072_v24 }
 0x1f9   :  { %4879 = vmatpush1.bf16.msra.mxu1 %v6091_v47  ;;  %4911 = vmatpush1.bf16.msra.mxu0 %v6082_v35 }
 0x1fa   :  { %4881 = vmatprep.subr.bf16.mxu1 %v6097_v50  ;;  %4913 = vmatprep.subr.bf16.mxu0 %v6086_v39 }
 0x1fd   :  { %4883 = vmatpush1.bf16.msra.mxu1 %v6103_v59  ;;  %4915 = vmatpush1.bf16.msra.mxu0 %v6094_v48 }
 0x1fe   :  { %4885 = vmatprep.subr.bf16.mxu1 %v6109_v62  ;;  %4917 = vmatprep.subr.bf16.mxu0 %v6100_v53 }
 0x201   :  { %4887 = vmatpush1.bf16.msra.mxu1 %v6115_v10  ;;  %4919 = vmatpush1.bf16.msra.mxu0 %v6106_v60 }
 0x202   :  { %4889 = vmatprep.subr.bf16.mxu1 %v6121_v14  ;;  %4921 = vmatprep.subr.bf16.mxu0 %v6112_v2 }
 0x205   :  { %4891 = vmatpush1.bf16.msra.mxu1 %v6127_v27  ;;  %4923 = vmatpush1.bf16.msra.mxu0 %v6118_v11 }
 0x206   :  { %4893 = vmatprep.subr.bf16.mxu1 %v6133_v31  ;;  %4925 = vmatprep.subr.bf16.mxu0 %v6124_v18 }
 0x209   :  { %4895 = vmatpush1.bf16.msra.mxu1 %v6145_v44  ;;  %4927 = vmatpush1.bf16.msra.mxu0 %v6130_v28 }
 0x20a   :  { %4897 = vmatprep.subr.bf16.mxu1 %v6151_v46  ;;  %4929 = vmatprep.subr.bf16.mxu0 %v6136_v36 }
 0x20d   :  { %4899 = vmatpush1.bf16.msra.mxu1 %v6169_v58  ;;  %4931 = vmatpush1.bf16.msra.mxu0 %v6148_v45 }
 0x20e   :  { %4933 = vmatprep.subr.bf16.mxu0 %v6154_v52  ;;  %4948 = vmatprep.subr.bf16.mxu1 %v7201_v43 }
 0x210   :  { %817 = vmatmul.mubr.f32.vlgmr.msra.gmra.mrb[4].mxu1 %v598_v54  ;;  %888 = vmatmul.mubr.f32.vlgmr.msra.gmra.mrb[8].mxu0 %v598_v54  ;;  %v7207_v54 = vld [vmem:[#allocation18_spill] sm:$0xff] }
 0x211   :  { %4935 = vmatpush1.bf16.msra.mxu0 %v6175_v63  ;;  %961 = vmatprep.mubr.f32.mxu0 %v7200_v3 }
 0x212   :  { %4937 = vmatprep.subr.bf16.mxu0 %v6179_v1  ;;  %4950 = vmatpush3.bf16.msra.mxu1 %v6253_v55 }
 0x213   :  { %4951 = vmatprep.subr.bf16.mxu1 %v7201_v43  ;;  %4317 = vmatprep.mubr.msk.f32.mxu1 %vm5961_vm0, %v7200_v3 }
 0x215   :  { %4939 = vmatpush1.bf16.msra.mxu0 %v6189_v5 }
 0x216   :  { %4941 = vmatprep.subr.bf16.mxu0 %v6202_v13  ;;  %4953 = vmatpush3.bf16.msra.mxu1 %v6275_v9 }
 0x217   :  { %4954 = vmatprep.subr.bf16.mxu1 %v7201_v43 }
 0x21a   :  { %4956 = vmatpush3.bf16.msra.mxu1 %v6295_v23 }
 0x21b   :  { %4957 = vmatprep.subr.bf16.mxu1 %v7201_v43 }
 0x21e   :  { %4959 = vmatpush3.bf16.msra.mxu1 %v6315_v51 }
 0x21f   :  { %4960 = vmatprep.subr.bf16.mxu1 %v7201_v43 }
 0x222   :  { %4962 = vmatpush3.bf16.msra.mxu1 %v6335_v15 }
 0x223   :  { %4963 = vmatprep.subr.bf16.mxu1 %v7201_v43 }
 0x226   :  { %4965 = vmatpush3.bf16.msra.mxu1 %v6355_v38 }
 0x227   :  { %4966 = vmatprep.subr.bf16.mxu1 %v7201_v43 }
 0x22a   :  { %4968 = vmatpush3.bf16.msra.mxu1 %v6375_v22 }
 0x22b   :  { %4969 = vmatprep.subr.bf16.mxu1 %v7201_v43 }
 0x22e   :  { %4971 = vmatpush3.bf16.msra.mxu1 %v6395_v6  ;;  %v7213_v6 = vld [vmem:[#allocation8_spill] sm:$0xff] }
 0x22f   :  { %4997 = vmatprep.subr.bf16.mxu1 %v6065_v16  ;;  %v7212_v16 = vld [vmem:[#allocation28_spill] sm:$0xff] }
 0x2c3   :  { %v671_v7 = vpop.f32.mrb[2].mxu1  ;;  %v748_v17 = vpop.f32.mrb[6].mxu0 }
 0x2c4   :  { %v672_v32 = vadd.f32 %v6489_v19, %v671_v7  ;;  %v749_v61 = vadd.f32 %v6494_v21, %v748_v17  ;;  %v4249_v56 = vpop.f32.mrb[3].mxu1  ;;  %v4284_v4 = vpop.f32.mrb[7].mxu0  ;;  %v7208_v7 = vld [vmem:[#allocation20_spill] sm:$0xff]  ;;  %v7209_v17 = vld [vmem:[#allocation22_spill] sm:$0xff] }
 0x2c5   :  { %v7211_v4 = vld [vmem:[#allocation26_spill] sm:$0xff] }
 0x2c6   :  { %675 = vst.msk [vmem:[%s7127_s12] sm:$0xff] %vm182_vm2, %v672_v32  ;;  %3911 = vmatmul.mubr.msk.f32.vlgmr.msra.gmra.mrb[10].mxu0 %vm404_vm3, %v749_v61 }
 0x2c7   :  { %4943 = vmatpush1.bf16.msra.mxu0 %v7202_v49  ;;  %1032 = vmatprep.mubr.f32.mxu0 %v7200_v3 }
 0x2c8   :  { %4945 = vmatprep.subr.bf16.mxu0 %v7203_v26 }
 0x2cb   :  { %4947 = vmatpush1.bf16.msra.mxu0 %v7204_v0 }
 0x2cc   :  { %4972 = vmatprep.subr.bf16.mxu0 %v7201_v43 }
 0x2ce   :  { %3912 = vmatmul.mubr.msk.f32.vlgmr.msra.gmra.mrb[8].mxu0 %vm404_vm3, %v749_v61  ;;  %v7210_v61 = vld [vmem:[#allocation24_spill] sm:$0xff] }
 0x2cf   :  { %4974 = vmatpush3.bf16.msra.mxu0 %v7205_v37  ;;  %4352 = vmatprep.mubr.msk.f32.mxu0 %vm5961_vm0, %v7200_v3 }
 0x2d0   :  { %4975 = vmatprep.subr.bf16.mxu0 %v7201_v43 }
 0x2d3   :  { %4977 = vmatpush3.bf16.msra.mxu0 %v7206_v30 }
 0x2d4   :  { %4978 = vmatprep.subr.bf16.mxu0 %v7201_v43 }
 0x2d7   :  { %4980 = vmatpush3.bf16.msra.mxu0 %v7207_v54 }
 0x2d8   :  { %4981 = vmatprep.subr.bf16.mxu0 %v7201_v43 }
 0x2db   :  { %4983 = vmatpush3.bf16.msra.mxu0 %v7208_v7  ;;  %v7214_v7 = vld [vmem:[#allocation29_spill] sm:$0xff] }
 0x2dc   :  { %4984 = vmatprep.subr.bf16.mxu0 %v7201_v43 }
 0x2df   :  { %4986 = vmatpush3.bf16.msra.mxu0 %v7209_v17 }
 0x2e0   :  { %4987 = vmatprep.subr.bf16.mxu0 %v7201_v43 }
 0x2e3   :  { %v818_v32 = vpop.f32.mrb[4].mxu1  ;;  %4989 = vmatpush3.bf16.msra.mxu0 %v7210_v61 }
 0x2e4   :  { %v820_v56 = vpop.f32.mrb[5].mxu1  ;;  %4990 = vmatprep.subr.bf16.mxu0 %v7201_v43 }
 0x2e7   :  { %4992 = vmatpush3.bf16.msra.mxu0 %v7211_v4 }
 0x2e8   :  { %4993 = vmatprep.subr.bf16.mxu0 %v7201_v43 }
 0x2eb   :  { %4995 = vmatpush3.bf16.msra.mxu0 %v7212_v16 }
 0x2ec   :  { %5029 = vmatprep.subr.bf16.mxu0 %v7213_v6 }
 0x399   :  { %v963_v22 = vpop.f32.mrb[10].mxu0 }
 0x39a   :  { %v964_v38 = vadd.f32 %v963_v22, %v818_v32  ;;  %v965_v15 = vpop.f32.mrb[11].mxu0 }
 0x39b   :  { %v966_v17 = vadd.f32 %v965_v15, %v820_v56 }
 0x39c   :  { %v1039_v51 = vadd.f32 %v964_v38, %v7214_v7 }
 0x39d   :  { %v1040_v54 = vadd.f32 %v966_v17, %v6411_v57 }
 0x39e   :  { %v3913_v61 = vmul.f32 -1.442695, %v1039_v51 }
 0x39f   :  { %v3914_v23 = vmul.f32 -1.442695, %v1040_v54 }
 0x3a0   :  { %5795 = vpow2.f32 %v3913_v61 }
 0x3a1   :  { %5797 = vpow2.f32 %v3914_v23  ;;  %v1034_v30 = vpop.f32.mrb[8].mxu0 }
 0x3a2   :  { %v1036_v4 = vpop.f32.mrb[9].mxu0  ;;  %v1041_v16 = vadd.f32 %v1034_v30, %v6420_v42 }
 0x3a3   :  { %v1042_v9 = vadd.f32 %v1036_v4, %v6417_v41 }
 0x3a5   :  { %v3915_v37 = vmul.f32 -1.442695, %v1042_v9 }
 0x3a7   :  { %5799 = vpow2.f32 %v3915_v37 }
 0x3a8   :  { %5801 = vtanh.f32 %v1041_v16 }
 0x3aa   :  { %v5796_v6 = vpop.eup %5795 }
 0x3ab   :  { %v5798_v55 = vpop.eup %5797  ;;  %v1046_v22 = vadd.f32 1.0, %v5796_v6 }
 0x3ac   :  { %v1052_v15 = vadd.f32 1.0, %v5798_v55 }
 0x3ad   :  { %5803 = vrcp.f32 %v1046_v22 }
 0x3ae   :  { %5805 = vrcp.f32 %v1052_v15  ;;  %v7215_v15 = vld [vmem:[#allocation13_spill] sm:$0xff] }
 0x3b1   :  { %v5800_v38 = vpop.eup %5799 }
 0x3b2   :  { %v5802_v51 = vpop.eup %5801  ;;  %v1059_v32 = vadd.f32 1.0, %v5800_v38  ;;  %v7216_v38 = vld [vmem:[#allocation14_spill] sm:$0xff] }
 0x3b4   :  { %5807 = vrcp.f32 %v1059_v32  ;;  %v7221_v32 = vld [vmem:[#allocation19_spill] sm:$0xff] }
 0x3b7   :  { %v5804_v54 = vpop.eup %5803 }
 0x3b8   :  { %v5806_v17 = vpop.eup %5805  ;;  %v1063_v23 = vmul.f32 %v5804_v54, %v5802_v51  ;;  %v7217_v51 = vld [vmem:[#allocation15_spill] sm:$0xff]  ;;  %v7218_v54 = vld [vmem:[#allocation16_spill] sm:$0xff] }
 0x3b9   :  { %v1062_v61 = vmul.f32 %v5806_v17, %v6426_v34  ;;  %v7219_v17 = vld [vmem:[#allocation17_spill] sm:$0xff] }
 0x3bb   :  { %v6532_v56 = vadd.f32 %v1063_v23, %v1062_v61  ;;  %v7220_v23 = vld [vmem:[#allocation18_spill] sm:$0xff]  ;;  %v7222_v61 = vld [vmem:[#allocation20_spill] sm:$0xff] }
 0x3bd   :  { %5809 = vtanh.f32 %v6532_v56 }
 0x3be   :  { %v5808_v9 = vpop.eup %5807 }
 0x3c7   :  { %v5810_v6 = vpop.eup %5809 }
 0x3c8   :  { %v1066_v37 = vmul.f32 %v5810_v6, %v5808_v9  ;;  %v7223_v9 = vld [vmem:[#allocation21_spill] sm:$0xff]  ;;  %v7224_v6 = vld [vmem:[#allocation22_spill] sm:$0xff] }
 0x3ca   :  { %4318 = vmatmul.mubr.f32.vlgmr.msra.gmra.mrb[6].mxu1 %v1066_v37  ;;  %4353 = vmatmul.mubr.f32.vlgmr.msra.gmra.mrb[12].mxu0 %v1066_v37 }
 0x3cb   :  { %4999 = vmatpush1.bf16.msra.mxu1 %v6074_v25  ;;  %5031 = vmatpush1.bf16.msra.mxu0 %v6059_v8 }
 0x3cc   :  { %5001 = vmatprep.subr.bf16.mxu1 %v6076_v29  ;;  %5033 = vmatprep.subr.bf16.mxu0 %v6061_v12 }
 0x3cd   :  { %1273 = vmatprep.mubr.f32.mxu1 %v7200_v3  ;;  %1344 = vmatprep.mubr.f32.mxu0 %v7200_v3 }
 0x3cf   :  { %5003 = vmatpush1.bf16.msra.mxu1 %v6079_v33  ;;  %5035 = vmatpush1.bf16.msra.mxu0 %v6068_v20 }
 0x3d0   :  { %5005 = vmatprep.subr.bf16.mxu1 %v6088_v40  ;;  %5037 = vmatprep.subr.bf16.mxu0 %v6072_v24 }
 0x3d3   :  { %5007 = vmatpush1.bf16.msra.mxu1 %v6091_v47  ;;  %5039 = vmatpush1.bf16.msra.mxu0 %v6082_v35 }
 0x3d4   :  { %5009 = vmatprep.subr.bf16.mxu1 %v6097_v50  ;;  %5041 = vmatprep.subr.bf16.mxu0 %v6086_v39 }
 0x3d7   :  { %5011 = vmatpush1.bf16.msra.mxu1 %v6103_v59  ;;  %5043 = vmatpush1.bf16.msra.mxu0 %v6094_v48 }
 0x3d8   :  { %5013 = vmatprep.subr.bf16.mxu1 %v6109_v62  ;;  %5045 = vmatprep.subr.bf16.mxu0 %v6100_v53 }
 0x3db   :  { %5015 = vmatpush1.bf16.msra.mxu1 %v6115_v10  ;;  %5047 = vmatpush1.bf16.msra.mxu0 %v6106_v60 }
 0x3dc   :  { %5017 = vmatprep.subr.bf16.mxu1 %v6121_v14  ;;  %5049 = vmatprep.subr.bf16.mxu0 %v6112_v2 }
 0x3df   :  { %5019 = vmatpush1.bf16.msra.mxu1 %v6127_v27  ;;  %5051 = vmatpush1.bf16.msra.mxu0 %v6118_v11 }
 0x3e0   :  { %5021 = vmatprep.subr.bf16.mxu1 %v6133_v31  ;;  %5053 = vmatprep.subr.bf16.mxu0 %v6124_v18 }
 0x3e3   :  { %5023 = vmatpush1.bf16.msra.mxu1 %v6145_v44  ;;  %5055 = vmatpush1.bf16.msra.mxu0 %v6130_v28 }
 0x3e4   :  { %5025 = vmatprep.subr.bf16.mxu1 %v6151_v46  ;;  %5057 = vmatprep.subr.bf16.mxu0 %v6136_v36 }
 0x3e7   :  { %5027 = vmatpush1.bf16.msra.mxu1 %v6169_v58  ;;  %5059 = vmatpush1.bf16.msra.mxu0 %v6148_v45 }
 0x3e8   :  { %5061 = vmatprep.subr.bf16.mxu1 %v6154_v52  ;;  %5069 = vmatprep.subr.bf16.mxu0 %v6202_v13 }
 0x3ea   :  { %1274 = vmatmul.mubr.f32.vlgmr.msra.gmra.mrb[8].mxu1 %v1066_v37  ;;  %1345 = vmatmul.mubr.f32.vlgmr.msra.gmra.mrb[14].mxu0 %v1066_v37  ;;  %v7225_v37 = vld [vmem:[#allocation23_spill] sm:$0xff] }
 0x3eb   :  { %5063 = vmatpush1.bf16.msra.mxu1 %v6175_v63  ;;  %5071 = vmatpush1.bf16.msra.mxu0 %v7202_v49 }
 0x3ec   :  { %5065 = vmatprep.subr.bf16.mxu1 %v6179_v1  ;;  %5073 = vmatprep.subr.bf16.mxu0 %v7203_v26 }
 0x3ed   :  { %1418 = vmatprep.mubr.f32.mxu1 %v7200_v3  ;;  %1489 = vmatprep.mubr.f32.mxu0 %v7200_v3 }
 0x3ef   :  { %5067 = vmatpush1.bf16.msra.mxu1 %v6189_v5  ;;  %5075 = vmatpush1.bf16.msra.mxu0 %v7204_v0 }
 0x3f0   :  { %5076 = vmatprep.subr.bf16.mxu1 %v7201_v43  ;;  %5100 = vmatprep.subr.bf16.mxu0 %v7201_v43 }
 0x49d   :  { %v1133_v16 = vpop.f32.mrb[6].mxu1  ;;  %v1205_v55 = vpop.f32.mrb[12].mxu0 }
 0x49e   :  { %v1134_v34 = vadd.f32 %v6489_v19, %v1133_v16  ;;  %v1206_v30 = vadd.f32 %v6494_v21, %v1205_v55  ;;  %v4319_v4 = vpop.f32.mrb[7].mxu1  ;;  %v4354_v22 = vpop.f32.mrb[13].mxu0  ;;  %v7226_v16 = vld [vmem:[#allocation24_spill] sm:$0xff]  ;;  %v7227_v55 = vld [vmem:[#allocation25_spill] sm:$0xff] }
 0x49f   :  { %v7230_v4 = vld [vmem:[#allocation28_spill] sm:$0xff]  ;;  %v7231_v22 = vld [vmem:[#allocation9_spill] sm:$0xff] }
 0x4a0   :  { %3916 = vst.msk [vmem:[%s7127_s12 + $0x8] sm:$0xff] %vm182_vm2, %v1134_v34  ;;  %3917 = vmatmul.mubr.msk.f32.vlgmr.msra.gmra.mrb[8].mxu1 %vm404_vm3, %v1206_v30  ;;  %3918 = vmatmul.mubr.msk.f32.vlgmr.msra.gmra.mrb[14].mxu0 %vm404_vm3, %v1206_v30  ;;  %v7228_v34 = vld [vmem:[#allocation26_spill] sm:$0xff]  ;;  %v7229_v30 = vld [vmem:[#allocation27_spill] sm:$0xff] }
 0x4a1   :  { %5078 = vmatpush3.bf16.msra.mxu1 %v7215_v15  ;;  %5102 = vmatpush3.bf16.msra.mxu0 %v7216_v38 }
 0x4a2   :  { %5079 = vmatprep.subr.bf16.mxu1 %v7201_v43  ;;  %5103 = vmatprep.subr.bf16.mxu0 %v7201_v43 }
 0x4a3   :  { %4387 = vmatprep.mubr.msk.f32.mxu1 %vm5961_vm0, %v7200_v3  ;;  %4422 = vmatprep.mubr.msk.f32.mxu0 %vm5961_vm0, %v7200_v3 }
 0x4a5   :  { %5081 = vmatpush3.bf16.msra.mxu1 %v7217_v51  ;;  %5105 = vmatpush3.bf16.msra.mxu0 %v7218_v54 }
 0x4a6   :  { %5082 = vmatprep.subr.bf16.mxu1 %v7201_v43  ;;  %5106 = vmatprep.subr.bf16.mxu0 %v7201_v43 }
 0x4a9   :  { %5084 = vmatpush3.bf16.msra.mxu1 %v7219_v17  ;;  %5108 = vmatpush3.bf16.msra.mxu0 %v7220_v23 }
 0x4aa   :  { %5085 = vmatprep.subr.bf16.mxu1 %v7201_v43  ;;  %5109 = vmatprep.subr.bf16.mxu0 %v7201_v43 }
 0x4ad   :  { %5087 = vmatpush3.bf16.msra.mxu1 %v7221_v32  ;;  %5111 = vmatpush3.bf16.msra.mxu0 %v7222_v61 }
 0x4ae   :  { %5088 = vmatprep.subr.bf16.mxu1 %v7201_v43  ;;  %5112 = vmatprep.subr.bf16.mxu0 %v7201_v43 }
 0x4b1   :  { %5090 = vmatpush3.bf16.msra.mxu1 %v7223_v9  ;;  %5114 = vmatpush3.bf16.msra.mxu0 %v7224_v6 }
 0x4b2   :  { %5091 = vmatprep.subr.bf16.mxu1 %v7201_v43  ;;  %5115 = vmatprep.subr.bf16.mxu0 %v7201_v43 }
 0x4b5   :  { %5093 = vmatpush3.bf16.msra.mxu1 %v7225_v37  ;;  %5117 = vmatpush3.bf16.msra.mxu0 %v7226_v16  ;;  %v7232_v37 = vld [vmem:[#allocation8_spill] sm:$0xff] }
 0x4b6   :  { %5094 = vmatprep.subr.bf16.mxu1 %v7201_v43  ;;  %5118 = vmatprep.subr.bf16.mxu0 %v7201_v43 }
 0x4b9   :  { %5096 = vmatpush3.bf16.msra.mxu1 %v7227_v55  ;;  %5120 = vmatpush3.bf16.msra.mxu0 %v7228_v34 }
 0x4ba   :  { %5097 = vmatprep.subr.bf16.mxu1 %v7201_v43  ;;  %5121 = vmatprep.subr.bf16.mxu0 %v7201_v43 }
 0x4bd   :  { %5099 = vmatpush3.bf16.msra.mxu1 %v7229_v30  ;;  %5123 = vmatpush3.bf16.msra.mxu0 %v7230_v4 }
 0x4be   :  { %5125 = vmatprep.subr.bf16.mxu1 %v7231_v22  ;;  %5157 = vmatprep.subr.bf16.mxu0 %v7232_v37 }
 0x573   :  { %v1420_v16 = vpop.f32.mrb[8].mxu1  ;;  %v1491_v6 = vpop.f32.mrb[14].mxu0 }
 0x574   :  { %v1496_v9 = vadd.f32 %v1420_v16, %v7214_v7  ;;  %v1422_v61 = vpop.f32.mrb[9].mxu1  ;;  %v1493_v55 = vpop.f32.mrb[15].mxu0  ;;  %v1498_v4 = vadd.f32 %v1491_v6, %v6420_v42 }
 0x575   :  { %v1497_v34 = vadd.f32 %v1422_v61, %v6411_v57  ;;  %v1499_v30 = vadd.f32 %v1493_v55, %v6417_v41 }
 0x576   :  { %v3919_v32 = vmul.f32 -1.442695, %v1496_v9 }
 0x577   :  { %v3920_v23 = vmul.f32 -1.442695, %v1497_v34  ;;  %v3921_v17 = vmul.f32 -1.442695, %v1499_v30 }
 0x578   :  { %5811 = vpow2.f32 %v3919_v32 }
 0x579   :  { %5813 = vpow2.f32 %v3920_v23 }
 0x57a   :  { %5815 = vpow2.f32 %v3921_v17 }
 0x57b   :  { %5817 = vtanh.f32 %v1498_v4 }
 0x582   :  { %v5812_v22 = vpop.eup %5811 }
 0x583   :  { %v5814_v54 = vpop.eup %5813  ;;  %v1503_v37 = vadd.f32 1.0, %v5812_v22  ;;  %v7233_v22 = vld [vmem:[#allocation15_spill] sm:$0xff] }
 0x584   :  { %v1509_v51 = vadd.f32 1.0, %v5814_v54  ;;  %v5816_v16 = vpop.eup %5815 }
 0x585   :  { %5819 = vrcp.f32 %v1503_v37  ;;  %v5818_v7 = vpop.eup %5817  ;;  %v1516_v32 = vadd.f32 1.0, %v5816_v16  ;;  %v7234_v16 = vld [vmem:[#allocation16_spill] sm:$0xff] }
 0x586   :  { %5821 = vrcp.f32 %v1509_v51 }
 0x587   :  { %5823 = vrcp.f32 %v1516_v32  ;;  %v7238_v32 = vld [vmem:[#allocation20_spill] sm:$0xff] }
 0x58f   :  { %v5820_v61 = vpop.eup %5819 }
 0x590   :  { %v5822_v9 = vpop.eup %5821  ;;  %v1520_v34 = vmul.f32 %v5820_v61, %v5818_v7  ;;  %v7235_v61 = vld [vmem:[#allocation17_spill] sm:$0xff] }
 0x591   :  { %v1519_v23 = vmul.f32 %v5822_v9, %v6532_v56  ;;  %v5824_v6 = vpop.eup %5823  ;;  %v7236_v9 = vld [vmem:[#allocation18_spill] sm:$0xff] }
 0x593   :  { %v6628_v55 = vadd.f32 %v1520_v34, %v1519_v23  ;;  %v7237_v34 = vld [vmem:[#allocation19_spill] sm:$0xff]  ;;  %v7239_v23 = vld [vmem:[#allocation21_spill] sm:$0xff] }
 0x595   :  { %5825 = vtanh.f32 %v6628_v55 }
 0x59f   :  { %v5826_v30 = vpop.eup %5825 }
 0x5a0   :  { %v1523_v17 = vmul.f32 %v5826_v30, %v5824_v6  ;;  %v7240_v6 = vld [vmem:[#allocation22_spill] sm:$0xff]  ;;  %v7241_v30 = vld [vmem:[#allocation23_spill] sm:$0xff] }
 0x5a2   :  { %4388 = vmatmul.mubr.f32.vlgmr.msra.gmra.mrb[10].mxu1 %v1523_v17  ;;  %4423 = vmatmul.mubr.f32.vlgmr.msra.gmra.mrb[16].mxu0 %v1523_v17 }
 0x5a3   :  { %5127 = vmatpush1.bf16.msra.mxu1 %v6074_v25  ;;  %5159 = vmatpush1.bf16.msra.mxu0 %v6059_v8 }
 0x5a4   :  { %5129 = vmatprep.subr.bf16.mxu1 %v6076_v29  ;;  %5161 = vmatprep.subr.bf16.mxu0 %v6061_v12 }
 0x5a5   :  { %1730 = vmatprep.mubr.f32.mxu1 %v7200_v3  ;;  %1801 = vmatprep.mubr.f32.mxu0 %v7200_v3 }
 0x5a7   :  { %5131 = vmatpush1.bf16.msra.mxu1 %v6079_v33  ;;  %5163 = vmatpush1.bf16.msra.mxu0 %v6068_v20 }
 0x5a8   :  { %5133 = vmatprep.subr.bf16.mxu1 %v6088_v40  ;;  %5165 = vmatprep.subr.bf16.mxu0 %v6072_v24 }
 0x5ab   :  { %5135 = vmatpush1.bf16.msra.mxu1 %v6091_v47  ;;  %5167 = vmatpush1.bf16.msra.mxu0 %v6082_v35 }
 0x5ac   :  { %5137 = vmatprep.subr.bf16.mxu1 %v6097_v50  ;;  %5169 = vmatprep.subr.bf16.mxu0 %v6086_v39 }
 0x5af   :  { %5139 = vmatpush1.bf16.msra.mxu1 %v6103_v59  ;;  %5171 = vmatpush1.bf16.msra.mxu0 %v6094_v48 }
 0x5b0   :  { %5141 = vmatprep.subr.bf16.mxu1 %v6109_v62  ;;  %5173 = vmatprep.subr.bf16.mxu0 %v6100_v53 }
 0x5b3   :  { %5143 = vmatpush1.bf16.msra.mxu1 %v6115_v10  ;;  %5175 = vmatpush1.bf16.msra.mxu0 %v6106_v60 }
 0x5b4   :  { %5145 = vmatprep.subr.bf16.mxu1 %v6121_v14  ;;  %5177 = vmatprep.subr.bf16.mxu0 %v6112_v2 }
 0x5b7   :  { %5147 = vmatpush1.bf16.msra.mxu1 %v6127_v27  ;;  %5179 = vmatpush1.bf16.msra.mxu0 %v6118_v11 }
 0x5b8   :  { %5149 = vmatprep.subr.bf16.mxu1 %v6133_v31  ;;  %5181 = vmatprep.subr.bf16.mxu0 %v6124_v18 }
 0x5bb   :  { %5151 = vmatpush1.bf16.msra.mxu1 %v6145_v44  ;;  %5183 = vmatpush1.bf16.msra.mxu0 %v6130_v28 }
 0x5bc   :  { %5153 = vmatprep.subr.bf16.mxu1 %v6151_v46  ;;  %5185 = vmatprep.subr.bf16.mxu0 %v6136_v36 }
 0x5bf   :  { %5155 = vmatpush1.bf16.msra.mxu1 %v6169_v58  ;;  %5187 = vmatpush1.bf16.msra.mxu0 %v6148_v45 }
 0x5c0   :  { %5189 = vmatprep.subr.bf16.mxu1 %v6154_v52  ;;  %5197 = vmatprep.subr.bf16.mxu0 %v6202_v13 }
 0x5c2   :  { %1731 = vmatmul.mubr.f32.vlgmr.msra.gmra.mrb[12].mxu1 %v1523_v17  ;;  %1802 = vmatmul.mubr.f32.vlgmr.msra.gmra.mrb[18].mxu0 %v1523_v17  ;;  %v7242_v17 = vld [vmem:[#allocation24_spill] sm:$0xff] }
 0x5c3   :  { %5191 = vmatpush1.bf16.msra.mxu1 %v6175_v63  ;;  %5199 = vmatpush1.bf16.msra.mxu0 %v7202_v49 }
 0x5c4   :  { %5193 = vmatprep.subr.bf16.mxu1 %v6179_v1  ;;  %5201 = vmatprep.subr.bf16.mxu0 %v7203_v26 }
 0x5c5   :  { %1875 = vmatprep.mubr.f32.mxu1 %v7200_v3  ;;  %1946 = vmatprep.mubr.f32.mxu0 %v7200_v3 }
 0x5c7   :  { %5195 = vmatpush1.bf16.msra.mxu1 %v6189_v5  ;;  %5203 = vmatpush1.bf16.msra.mxu0 %v7204_v0 }
 0x5c8   :  { %5204 = vmatprep.subr.bf16.mxu1 %v7201_v43  ;;  %5228 = vmatprep.subr.bf16.mxu0 %v7201_v43 }
 0x675   :  { %v1590_v7 = vpop.f32.mrb[10].mxu1  ;;  %v1662_v56 = vpop.f32.mrb[16].mxu0 }
 0x676   :  { %v1591_v51 = vadd.f32 %v6489_v19, %v1590_v7  ;;  %v1663_v54 = vadd.f32 %v6494_v21, %v1662_v56  ;;  %v4389_v37 = vpop.f32.mrb[11].mxu1  ;;  %v4424_v4 = vpop.f32.mrb[17].mxu0  ;;  %v7243_v7 = vld [vmem:[#allocation25_spill] sm:$0xff]  ;;  %v7244_v56 = vld [vmem:[#allocation26_spill] sm:$0xff] }
 0x677   :  { %v7247_v37 = vld [vmem:[#allocation9_spill] sm:$0xff]  ;;  %v7248_v4 = vld [vmem:[#allocation8_spill] sm:$0xff] }
 0x678   :  { %3922 = vst.msk [vmem:[%s7127_s12 + $0x10] sm:$0xff] %vm182_vm2, %v1591_v51  ;;  %3923 = vmatmul.mubr.msk.f32.vlgmr.msra.gmra.mrb[12].mxu1 %vm404_vm3, %v1663_v54  ;;  %3924 = vmatmul.mubr.msk.f32.vlgmr.msra.gmra.mrb[18].mxu0 %vm404_vm3, %v1663_v54  ;;  %v7245_v51 = vld [vmem:[#allocation27_spill] sm:$0xff]  ;;  %v7246_v54 = vld [vmem:[#allocation28_spill] sm:$0xff] }
 0x679   :  { %5206 = vmatpush3.bf16.msra.mxu1 %v7215_v15  ;;  %5230 = vmatpush3.bf16.msra.mxu0 %v7216_v38 }
 0x67a   :  { %5207 = vmatprep.subr.bf16.mxu1 %v7201_v43  ;;  %5231 = vmatprep.subr.bf16.mxu0 %v7201_v43 }
 0x67b   :  { %4457 = vmatprep.mubr.msk.f32.mxu1 %vm5961_vm0, %v7200_v3  ;;  %4492 = vmatprep.mubr.msk.f32.mxu0 %vm5961_vm0, %v7200_v3 }
 0x67d   :  { %5209 = vmatpush3.bf16.msra.mxu1 %v7233_v22  ;;  %5233 = vmatpush3.bf16.msra.mxu0 %v7234_v16 }
 0x67e   :  { %5210 = vmatprep.subr.bf16.mxu1 %v7201_v43  ;;  %5234 = vmatprep.subr.bf16.mxu0 %v7201_v43 }
 0x681   :  { %5212 = vmatpush3.bf16.msra.mxu1 %v7235_v61  ;;  %5236 = vmatpush3.bf16.msra.mxu0 %v7236_v9 }
 0x682   :  { %5213 = vmatprep.subr.bf16.mxu1 %v7201_v43  ;;  %5237 = vmatprep.subr.bf16.mxu0 %v7201_v43 }
 0x685   :  { %5215 = vmatpush3.bf16.msra.mxu1 %v7237_v34  ;;  %5239 = vmatpush3.bf16.msra.mxu0 %v7238_v32 }
 0x686   :  { %5216 = vmatprep.subr.bf16.mxu1 %v7201_v43  ;;  %5240 = vmatprep.subr.bf16.mxu0 %v7201_v43 }
 0x689   :  { %5218 = vmatpush3.bf16.msra.mxu1 %v7239_v23  ;;  %5242 = vmatpush3.bf16.msra.mxu0 %v7240_v6  ;;  %v7249_v6 = vld [vmem:[#allocation29_spill] sm:$0xff] }
 0x68a   :  { %5219 = vmatprep.subr.bf16.mxu1 %v7201_v43  ;;  %5243 = vmatprep.subr.bf16.mxu0 %v7201_v43 }
 0x68d   :  { %5221 = vmatpush3.bf16.msra.mxu1 %v7241_v30  ;;  %5245 = vmatpush3.bf16.msra.mxu0 %v7242_v17 }
 0x68e   :  { %5222 = vmatprep.subr.bf16.mxu1 %v7201_v43  ;;  %5246 = vmatprep.subr.bf16.mxu0 %v7201_v43 }
 0x691   :  { %5224 = vmatpush3.bf16.msra.mxu1 %v7243_v7  ;;  %5248 = vmatpush3.bf16.msra.mxu0 %v7244_v56 }
 0x692   :  { %5225 = vmatprep.subr.bf16.mxu1 %v7201_v43  ;;  %5249 = vmatprep.subr.bf16.mxu0 %v7201_v43 }
 0x695   :  { %5227 = vmatpush3.bf16.msra.mxu1 %v7245_v51  ;;  %5251 = vmatpush3.bf16.msra.mxu0 %v7246_v54 }
 0x696   :  { %5253 = vmatprep.subr.bf16.mxu1 %v7247_v37  ;;  %5285 = vmatprep.subr.bf16.mxu0 %v7248_v4 }
 0x74b   :  { %v1877_v17 = vpop.f32.mrb[12].mxu1  ;;  %v1948_v30 = vpop.f32.mrb[18].mxu0 }
 0x74c   :  { %v1953_v23 = vadd.f32 %v1877_v17, %v7249_v6  ;;  %v1879_v32 = vpop.f32.mrb[13].mxu1  ;;  %v1950_v7 = vpop.f32.mrb[19].mxu0  ;;  %v1955_v54 = vadd.f32 %v1948_v30, %v6420_v42 }
 0x74d   :  { %v1954_v56 = vadd.f32 %v1879_v32, %v6411_v57  ;;  %v1956_v51 = vadd.f32 %v1950_v7, %v6417_v41 }
 0x74e   :  { %v3925_v34 = vmul.f32 -1.442695, %v1953_v23 }
 0x74f   :  { %v3926_v9 = vmul.f32 -1.442695, %v1954_v56  ;;  %v3927_v61 = vmul.f32 -1.442695, %v1956_v51 }
 0x750   :  { %5827 = vpow2.f32 %v3925_v34 }
 0x751   :  { %5829 = vpow2.f32 %v3926_v9 }
 0x752   :  { %5831 = vpow2.f32 %v3927_v61 }
 0x753   :  { %5833 = vtanh.f32 %v1955_v54 }
 0x75a   :  { %v5828_v37 = vpop.eup %5827 }
 0x75b   :  { %v5830_v16 = vpop.eup %5829  ;;  %v1960_v4 = vadd.f32 1.0, %v5828_v37 }
 0x75c   :  { %v1966_v22 = vadd.f32 1.0, %v5830_v16  ;;  %v5832_v17 = vpop.eup %5831 }
 0x75d   :  { %5835 = vrcp.f32 %v1960_v4  ;;  %v5834_v6 = vpop.eup %5833  ;;  %v1973_v34 = vadd.f32 1.0, %v5832_v17  ;;  %v7250_v4 = vld [vmem:[#allocation15_spill] sm:$0xff]  ;;  %v7251_v17 = vld [vmem:[#allocation16_spill] sm:$0xff] }
 0x75e   :  { %5837 = vrcp.f32 %v1966_v22 }
 0x75f   :  { %5839 = vrcp.f32 %v1973_v34  ;;  %v7255_v34 = vld [vmem:[#allocation20_spill] sm:$0xff] }
 0x767   :  { %v5836_v32 = vpop.eup %5835 }
 0x768   :  { %v5838_v23 = vpop.eup %5837  ;;  %v1977_v56 = vmul.f32 %v5836_v32, %v5834_v6  ;;  %v7252_v32 = vld [vmem:[#allocation17_spill] sm:$0xff] }
 0x769   :  { %v1976_v9 = vmul.f32 %v5838_v23, %v6628_v55  ;;  %v5840_v30 = vpop.eup %5839  ;;  %v7253_v23 = vld [vmem:[#allocation18_spill] sm:$0xff] }
 0x76b   :  { %v6724_v7 = vadd.f32 %v1977_v56, %v1976_v9  ;;  %v7254_v56 = vld [vmem:[#allocation19_spill] sm:$0xff]  ;;  %v7256_v9 = vld [vmem:[#allocation21_spill] sm:$0xff] }
 0x76d   :  { %5841 = vtanh.f32 %v6724_v7 }
 0x777   :  { %v5842_v51 = vpop.eup %5841 }
 0x778   :  { %v1980_v61 = vmul.f32 %v5842_v51, %v5840_v30  ;;  %v7257_v30 = vld [vmem:[#allocation22_spill] sm:$0xff]  ;;  %v7258_v51 = vld [vmem:[#allocation23_spill] sm:$0xff] }
 0x77a   :  { %4458 = vmatmul.mubr.f32.vlgmr.msra.gmra.mrb[14].mxu1 %v1980_v61  ;;  %4493 = vmatmul.mubr.f32.vlgmr.msra.gmra.mrb[20].mxu0 %v1980_v61 }
 0x77b   :  { %5255 = vmatpush1.bf16.msra.mxu1 %v6074_v25  ;;  %5287 = vmatpush1.bf16.msra.mxu0 %v6059_v8 }
 0x77c   :  { %5257 = vmatprep.subr.bf16.mxu1 %v6076_v29  ;;  %5289 = vmatprep.subr.bf16.mxu0 %v6061_v12 }
 0x77d   :  { %2187 = vmatprep.mubr.f32.mxu1 %v7200_v3  ;;  %2258 = vmatprep.mubr.f32.mxu0 %v7200_v3 }
 0x77f   :  { %5259 = vmatpush1.bf16.msra.mxu1 %v6079_v33  ;;  %5291 = vmatpush1.bf16.msra.mxu0 %v6068_v20 }
 0x780   :  { %5261 = vmatprep.subr.bf16.mxu1 %v6088_v40  ;;  %5293 = vmatprep.subr.bf16.mxu0 %v6072_v24 }
 0x783   :  { %5263 = vmatpush1.bf16.msra.mxu1 %v6091_v47  ;;  %5295 = vmatpush1.bf16.msra.mxu0 %v6082_v35 }
 0x784   :  { %5265 = vmatprep.subr.bf16.mxu1 %v6097_v50  ;;  %5297 = vmatprep.subr.bf16.mxu0 %v6086_v39 }
 0x787   :  { %5267 = vmatpush1.bf16.msra.mxu1 %v6103_v59  ;;  %5299 = vmatpush1.bf16.msra.mxu0 %v6094_v48 }
 0x788   :  { %5269 = vmatprep.subr.bf16.mxu1 %v6109_v62  ;;  %5301 = vmatprep.subr.bf16.mxu0 %v6100_v53 }
 0x78b   :  { %5271 = vmatpush1.bf16.msra.mxu1 %v6115_v10  ;;  %5303 = vmatpush1.bf16.msra.mxu0 %v6106_v60 }
 0x78c   :  { %5273 = vmatprep.subr.bf16.mxu1 %v6121_v14  ;;  %5305 = vmatprep.subr.bf16.mxu0 %v6112_v2 }
 0x78f   :  { %5275 = vmatpush1.bf16.msra.mxu1 %v6127_v27  ;;  %5307 = vmatpush1.bf16.msra.mxu0 %v6118_v11 }
 0x790   :  { %5277 = vmatprep.subr.bf16.mxu1 %v6133_v31  ;;  %5309 = vmatprep.subr.bf16.mxu0 %v6124_v18 }
 0x793   :  { %5279 = vmatpush1.bf16.msra.mxu1 %v6145_v44  ;;  %5311 = vmatpush1.bf16.msra.mxu0 %v6130_v28 }
 0x794   :  { %5281 = vmatprep.subr.bf16.mxu1 %v6151_v46  ;;  %5313 = vmatprep.subr.bf16.mxu0 %v6136_v36 }
 0x797   :  { %5283 = vmatpush1.bf16.msra.mxu1 %v6169_v58  ;;  %5315 = vmatpush1.bf16.msra.mxu0 %v6148_v45 }
 0x798   :  { %5317 = vmatprep.subr.bf16.mxu1 %v6154_v52  ;;  %5325 = vmatprep.subr.bf16.mxu0 %v6202_v13 }
 0x79a   :  { %2188 = vmatmul.mubr.f32.vlgmr.msra.gmra.mrb[16].mxu1 %v1980_v61  ;;  %2259 = vmatmul.mubr.f32.vlgmr.msra.gmra.mrb[22].mxu0 %v1980_v61  ;;  %v7259_v61 = vld [vmem:[#allocation24_spill] sm:$0xff] }
 0x79b   :  { %5319 = vmatpush1.bf16.msra.mxu1 %v6175_v63  ;;  %5327 = vmatpush1.bf16.msra.mxu0 %v7202_v49 }
 0x79c   :  { %5321 = vmatprep.subr.bf16.mxu1 %v6179_v1  ;;  %5329 = vmatprep.subr.bf16.mxu0 %v7203_v26 }
 0x79d   :  { %2332 = vmatprep.mubr.f32.mxu1 %v7200_v3  ;;  %2403 = vmatprep.mubr.f32.mxu0 %v7200_v3 }
 0x79f   :  { %5323 = vmatpush1.bf16.msra.mxu1 %v6189_v5  ;;  %5331 = vmatpush1.bf16.msra.mxu0 %v7204_v0 }
 0x7a0   :  { %5332 = vmatprep.subr.bf16.mxu1 %v7201_v43  ;;  %5356 = vmatprep.subr.bf16.mxu0 %v7201_v43 }
 0x84d   :  { %v2047_v55 = vpop.f32.mrb[14].mxu1  ;;  %v2119_v22 = vpop.f32.mrb[20].mxu0 }
 0x84e   :  { %v2048_v16 = vadd.f32 %v6489_v19, %v2047_v55  ;;  %v2120_v6 = vadd.f32 %v6494_v21, %v2119_v22  ;;  %v4459_v54 = vpop.f32.mrb[15].mxu1  ;;  %v4494_v37 = vpop.f32.mrb[21].mxu0  ;;  %v7260_v55 = vld [vmem:[#allocation25_spill] sm:$0xff]  ;;  %v7261_v22 = vld [vmem:[#allocation26_spill] sm:$0xff] }
 0x84f   :  { %v7264_v54 = vld [vmem:[#allocation9_spill] sm:$0xff]  ;;  %v7265_v37 = vld [vmem:[#allocation8_spill] sm:$0xff] }
 0x850   :  { %3928 = vst.msk [vmem:[%s7127_s12 + $0x18] sm:$0xff] %vm182_vm2, %v2048_v16  ;;  %3929 = vmatmul.mubr.msk.f32.vlgmr.msra.gmra.mrb[16].mxu1 %vm404_vm3, %v2120_v6  ;;  %3930 = vmatmul.mubr.msk.f32.vlgmr.msra.gmra.mrb[22].mxu0 %vm404_vm3, %v2120_v6  ;;  %v7262_v16 = vld [vmem:[#allocation27_spill] sm:$0xff]  ;;  %v7263_v6 = vld [vmem:[#allocation28_spill] sm:$0xff] }
 0x851   :  { %5334 = vmatpush3.bf16.msra.mxu1 %v7215_v15  ;;  %5358 = vmatpush3.bf16.msra.mxu0 %v7216_v38 }
 0x852   :  { %5335 = vmatprep.subr.bf16.mxu1 %v7201_v43  ;;  %5359 = vmatprep.subr.bf16.mxu0 %v7201_v43 }
 0x853   :  { %4527 = vmatprep.mubr.msk.f32.mxu1 %vm5961_vm0, %v7200_v3  ;;  %4562 = vmatprep.mubr.msk.f32.mxu0 %vm5961_vm0, %v7200_v3 }
 0x855   :  { %5337 = vmatpush3.bf16.msra.mxu1 %v7250_v4  ;;  %5361 = vmatpush3.bf16.msra.mxu0 %v7251_v17 }
 0x856   :  { %5338 = vmatprep.subr.bf16.mxu1 %v7201_v43  ;;  %5362 = vmatprep.subr.bf16.mxu0 %v7201_v43 }
 0x859   :  { %5340 = vmatpush3.bf16.msra.mxu1 %v7252_v32  ;;  %5364 = vmatpush3.bf16.msra.mxu0 %v7253_v23 }
 0x85a   :  { %5341 = vmatprep.subr.bf16.mxu1 %v7201_v43  ;;  %5365 = vmatprep.subr.bf16.mxu0 %v7201_v43 }
 0x85d   :  { %5343 = vmatpush3.bf16.msra.mxu1 %v7254_v56  ;;  %5367 = vmatpush3.bf16.msra.mxu0 %v7255_v34 }
 0x85e   :  { %5344 = vmatprep.subr.bf16.mxu1 %v7201_v43  ;;  %5368 = vmatprep.subr.bf16.mxu0 %v7201_v43 }
 0x861   :  { %5346 = vmatpush3.bf16.msra.mxu1 %v7256_v9  ;;  %5370 = vmatpush3.bf16.msra.mxu0 %v7257_v30  ;;  %v7266_v30 = vld [vmem:[#allocation29_spill] sm:$0xff] }
 0x862   :  { %5347 = vmatprep.subr.bf16.mxu1 %v7201_v43  ;;  %5371 = vmatprep.subr.bf16.mxu0 %v7201_v43 }
 0x865   :  { %5349 = vmatpush3.bf16.msra.mxu1 %v7258_v51  ;;  %5373 = vmatpush3.bf16.msra.mxu0 %v7259_v61 }
 0x866   :  { %5350 = vmatprep.subr.bf16.mxu1 %v7201_v43  ;;  %5374 = vmatprep.subr.bf16.mxu0 %v7201_v43 }
 0x869   :  { %5352 = vmatpush3.bf16.msra.mxu1 %v7260_v55  ;;  %5376 = vmatpush3.bf16.msra.mxu0 %v7261_v22 }
 0x86a   :  { %5353 = vmatprep.subr.bf16.mxu1 %v7201_v43  ;;  %5377 = vmatprep.subr.bf16.mxu0 %v7201_v43 }
 0x86d   :  { %5355 = vmatpush3.bf16.msra.mxu1 %v7262_v16  ;;  %5379 = vmatpush3.bf16.msra.mxu0 %v7263_v6 }
 0x86e   :  { %5381 = vmatprep.subr.bf16.mxu1 %v7264_v54  ;;  %5413 = vmatprep.subr.bf16.mxu0 %v7265_v37 }
 0x923   :  { %v2334_v61 = vpop.f32.mrb[16].mxu1  ;;  %v2405_v51 = vpop.f32.mrb[22].mxu0 }
 0x924   :  { %v2410_v9 = vadd.f32 %v2334_v61, %v7266_v30  ;;  %v2336_v34 = vpop.f32.mrb[17].mxu1  ;;  %v2407_v55 = vpop.f32.mrb[23].mxu0  ;;  %v2412_v6 = vadd.f32 %v2405_v51, %v6420_v42 }
 0x925   :  { %v2411_v22 = vadd.f32 %v2336_v34, %v6411_v57  ;;  %v2413_v16 = vadd.f32 %v2407_v55, %v6417_v41 }
 0x926   :  { %v3931_v56 = vmul.f32 -1.442695, %v2410_v9 }
 0x927   :  { %v3932_v23 = vmul.f32 -1.442695, %v2411_v22  ;;  %v3933_v32 = vmul.f32 -1.442695, %v2413_v16 }
 0x928   :  { %5843 = vpow2.f32 %v3931_v56 }
 0x929   :  { %5845 = vpow2.f32 %v3932_v23 }
 0x92a   :  { %5847 = vpow2.f32 %v3933_v32 }
 0x92b   :  { %5849 = vtanh.f32 %v2412_v6 }
 0x932   :  { %v5844_v54 = vpop.eup %5843 }
 0x933   :  { %v5846_v17 = vpop.eup %5845  ;;  %v2417_v37 = vadd.f32 1.0, %v5844_v54 }
 0x934   :  { %v2423_v4 = vadd.f32 1.0, %v5846_v17  ;;  %v5848_v61 = vpop.eup %5847 }
 0x935   :  { %5851 = vrcp.f32 %v2417_v37  ;;  %v5850_v30 = vpop.eup %5849  ;;  %v2430_v56 = vadd.f32 1.0, %v5848_v61  ;;  %v7269_v37 = vld [vmem:[#allocation17_spill] sm:$0xff]  ;;  %v7270_v61 = vld [vmem:[#allocation18_spill] sm:$0xff] }
 0x936   :  { %5853 = vrcp.f32 %v2423_v4 }
 0x937   :  { %5855 = vrcp.f32 %v2430_v56  ;;  %v7274_v56 = vld [vmem:[#allocation22_spill] sm:$0xff] }
 0x93f   :  { %v5852_v34 = vpop.eup %5851 }
 0x940   :  { %v5854_v9 = vpop.eup %5853  ;;  %v2434_v22 = vmul.f32 %v5852_v34, %v5850_v30  ;;  %v7271_v34 = vld [vmem:[#allocation19_spill] sm:$0xff] }
 0x941   :  { %v2433_v23 = vmul.f32 %v5854_v9, %v6724_v7  ;;  %v5856_v51 = vpop.eup %5855  ;;  %v7272_v9 = vld [vmem:[#allocation20_spill] sm:$0xff] }
 0x943   :  { %v6820_v55 = vadd.f32 %v2434_v22, %v2433_v23  ;;  %v7273_v22 = vld [vmem:[#allocation21_spill] sm:$0xff]  ;;  %v7275_v23 = vld [vmem:[#allocation23_spill] sm:$0xff] }
 0x945   :  { %5857 = vtanh.f32 %v6820_v55 }
 0x94f   :  { %v5858_v16 = vpop.eup %5857 }
 0x950   :  { %v2437_v32 = vmul.f32 %v5858_v16, %v5856_v51  ;;  %v7276_v51 = vld [vmem:[#allocation24_spill] sm:$0xff]  ;;  %v7277_v16 = vld [vmem:[#allocation25_spill] sm:$0xff] }
 0x952   :  { %4528 = vmatmul.mubr.f32.vlgmr.msra.gmra.mrb[18].mxu1 %v2437_v32  ;;  %4563 = vmatmul.mubr.f32.vlgmr.msra.gmra.mrb[24].mxu0 %v2437_v32 }
 0x953   :  { %5383 = vmatpush1.bf16.msra.mxu1 %v6074_v25  ;;  %5415 = vmatpush1.bf16.msra.mxu0 %v6059_v8 }
 0x954   :  { %5385 = vmatprep.subr.bf16.mxu1 %v6076_v29  ;;  %5417 = vmatprep.subr.bf16.mxu0 %v6061_v12 }
 0x955   :  { %2644 = vmatprep.mubr.f32.mxu1 %v7200_v3  ;;  %2715 = vmatprep.mubr.f32.mxu0 %v7200_v3 }
 0x957   :  { %5387 = vmatpush1.bf16.msra.mxu1 %v6079_v33  ;;  %5419 = vmatpush1.bf16.msra.mxu0 %v6068_v20 }
 0x958   :  { %5389 = vmatprep.subr.bf16.mxu1 %v6088_v40  ;;  %5421 = vmatprep.subr.bf16.mxu0 %v6072_v24 }
 0x95b   :  { %5391 = vmatpush1.bf16.msra.mxu1 %v6091_v47  ;;  %5423 = vmatpush1.bf16.msra.mxu0 %v6082_v35 }
 0x95c   :  { %5393 = vmatprep.subr.bf16.mxu1 %v6097_v50  ;;  %5425 = vmatprep.subr.bf16.mxu0 %v6086_v39 }
 0x95f   :  { %5395 = vmatpush1.bf16.msra.mxu1 %v6103_v59  ;;  %5427 = vmatpush1.bf16.msra.mxu0 %v6094_v48 }
 0x960   :  { %5397 = vmatprep.subr.bf16.mxu1 %v6109_v62  ;;  %5429 = vmatprep.subr.bf16.mxu0 %v6100_v53 }
 0x963   :  { %5399 = vmatpush1.bf16.msra.mxu1 %v6115_v10  ;;  %5431 = vmatpush1.bf16.msra.mxu0 %v6106_v60 }
 0x964   :  { %5401 = vmatprep.subr.bf16.mxu1 %v6121_v14  ;;  %5433 = vmatprep.subr.bf16.mxu0 %v6112_v2 }
 0x967   :  { %5403 = vmatpush1.bf16.msra.mxu1 %v6127_v27  ;;  %5435 = vmatpush1.bf16.msra.mxu0 %v6118_v11 }
 0x968   :  { %5405 = vmatprep.subr.bf16.mxu1 %v6133_v31  ;;  %5437 = vmatprep.subr.bf16.mxu0 %v6124_v18 }
 0x96b   :  { %5407 = vmatpush1.bf16.msra.mxu1 %v6145_v44  ;;  %5439 = vmatpush1.bf16.msra.mxu0 %v6130_v28 }
 0x96c   :  { %5409 = vmatprep.subr.bf16.mxu1 %v6151_v46  ;;  %5441 = vmatprep.subr.bf16.mxu0 %v6136_v36 }
 0x96f   :  { %5411 = vmatpush1.bf16.msra.mxu1 %v6169_v58  ;;  %5443 = vmatpush1.bf16.msra.mxu0 %v6148_v45 }
 0x970   :  { %5445 = vmatprep.subr.bf16.mxu1 %v6154_v52  ;;  %5453 = vmatprep.subr.bf16.mxu0 %v6202_v13 }
 0x972   :  { %2645 = vmatmul.mubr.f32.vlgmr.msra.gmra.mrb[20].mxu1 %v2437_v32  ;;  %2716 = vmatmul.mubr.f32.vlgmr.msra.gmra.mrb[26].mxu0 %v2437_v32  ;;  %v7278_v32 = vld [vmem:[#allocation26_spill] sm:$0xff] }
 0x973   :  { %5447 = vmatpush1.bf16.msra.mxu1 %v6175_v63  ;;  %5455 = vmatpush1.bf16.msra.mxu0 %v7202_v49 }
 0x974   :  { %5449 = vmatprep.subr.bf16.mxu1 %v6179_v1  ;;  %5457 = vmatprep.subr.bf16.mxu0 %v7203_v26 }
 0x975   :  { %2789 = vmatprep.mubr.f32.mxu1 %v7200_v3  ;;  %2860 = vmatprep.mubr.f32.mxu0 %v7200_v3 }
 0x977   :  { %5451 = vmatpush1.bf16.msra.mxu1 %v6189_v5  ;;  %5459 = vmatpush1.bf16.msra.mxu0 %v7204_v0 }
 0x978   :  { %5460 = vmatprep.subr.bf16.mxu1 %v7201_v43  ;;  %5484 = vmatprep.subr.bf16.mxu0 %v7201_v43 }
 0xa25   :  { %v2504_v7 = vpop.f32.mrb[18].mxu1  ;;  %v2576_v4 = vpop.f32.mrb[24].mxu0 }
 0xa26   :  { %v2505_v17 = vadd.f32 %v6489_v19, %v2504_v7  ;;  %v2577_v30 = vadd.f32 %v6494_v21, %v2576_v4  ;;  %v4529_v6 = vpop.f32.mrb[19].mxu1  ;;  %v4564_v54 = vpop.f32.mrb[25].mxu0  ;;  %v7267_v19 = vld [vmem:[#allocation15_spill] sm:$0xff]  ;;  %v7268_v21 = vld [vmem:[#allocation16_spill] sm:$0xff] }
 0xa27   :  { %v7279_v7 = vld [vmem:[#allocation27_spill] sm:$0xff]  ;;  %v7280_v4 = vld [vmem:[#allocation28_spill] sm:$0xff] }
 0xa28   :  { %3934 = vst.msk [vmem:[%s7127_s12 + $0x20] sm:$0xff] %vm182_vm2, %v2505_v17  ;;  %3935 = vmatmul.mubr.msk.f32.vlgmr.msra.gmra.mrb[20].mxu1 %vm404_vm3, %v2577_v30  ;;  %3936 = vmatmul.mubr.msk.f32.vlgmr.msra.gmra.mrb[26].mxu0 %vm404_vm3, %v2577_v30  ;;  %v7281_v17 = vld [vmem:[#allocation9_spill] sm:$0xff]  ;;  %v7282_v30 = vld [vmem:[#allocation8_spill] sm:$0xff] }
 0xa29   :  { %5462 = vmatpush3.bf16.msra.mxu1 %v7215_v15  ;;  %5486 = vmatpush3.bf16.msra.mxu0 %v7216_v38 }
 0xa2a   :  { %5463 = vmatprep.subr.bf16.mxu1 %v7201_v43  ;;  %5487 = vmatprep.subr.bf16.mxu0 %v7201_v43 }
 0xa2b   :  { %4597 = vmatprep.mubr.msk.f32.mxu1 %vm5961_vm0, %v7200_v3  ;;  %4632 = vmatprep.mubr.msk.f32.mxu0 %vm5961_vm0, %v7200_v3 }
 0xa2d   :  { %5465 = vmatpush3.bf16.msra.mxu1 %v7267_v19  ;;  %5489 = vmatpush3.bf16.msra.mxu0 %v7268_v21 }
 0xa2e   :  { %5466 = vmatprep.subr.bf16.mxu1 %v7201_v43  ;;  %5490 = vmatprep.subr.bf16.mxu0 %v7201_v43 }
 0xa31   :  { %5468 = vmatpush3.bf16.msra.mxu1 %v7269_v37  ;;  %5492 = vmatpush3.bf16.msra.mxu0 %v7270_v61 }
 0xa32   :  { %5469 = vmatprep.subr.bf16.mxu1 %v7201_v43  ;;  %5493 = vmatprep.subr.bf16.mxu0 %v7201_v43 }
 0xa35   :  { %5471 = vmatpush3.bf16.msra.mxu1 %v7271_v34  ;;  %5495 = vmatpush3.bf16.msra.mxu0 %v7272_v9 }
 0xa36   :  { %5472 = vmatprep.subr.bf16.mxu1 %v7201_v43  ;;  %5496 = vmatprep.subr.bf16.mxu0 %v7201_v43 }
 0xa39   :  { %5474 = vmatpush3.bf16.msra.mxu1 %v7273_v22  ;;  %5498 = vmatpush3.bf16.msra.mxu0 %v7274_v56 }
 0xa3a   :  { %5475 = vmatprep.subr.bf16.mxu1 %v7201_v43  ;;  %5499 = vmatprep.subr.bf16.mxu0 %v7201_v43 }
 0xa3d   :  { %5477 = vmatpush3.bf16.msra.mxu1 %v7275_v23  ;;  %5501 = vmatpush3.bf16.msra.mxu0 %v7276_v51  ;;  %v7283_v51 = vld [vmem:[#allocation29_spill] sm:$0xff] }
 0xa3e   :  { %5478 = vmatprep.subr.bf16.mxu1 %v7201_v43  ;;  %5502 = vmatprep.subr.bf16.mxu0 %v7201_v43 }
 0xa41   :  { %5480 = vmatpush3.bf16.msra.mxu1 %v7277_v16  ;;  %5504 = vmatpush3.bf16.msra.mxu0 %v7278_v32 }
 0xa42   :  { %5481 = vmatprep.subr.bf16.mxu1 %v7201_v43  ;;  %5505 = vmatprep.subr.bf16.mxu0 %v7201_v43 }
 0xa45   :  { %5483 = vmatpush3.bf16.msra.mxu1 %v7279_v7  ;;  %5507 = vmatpush3.bf16.msra.mxu0 %v7280_v4 }
 0xa46   :  { %5509 = vmatprep.subr.bf16.mxu1 %v7281_v17  ;;  %5541 = vmatprep.subr.bf16.mxu0 %v7282_v30 }
 0xafb   :  { %v2791_v6 = vpop.f32.mrb[20].mxu1  ;;  %v2862_v54 = vpop.f32.mrb[26].mxu0 }
 0xafc   :  { %v2867_v23 = vadd.f32 %v2791_v6, %v7283_v51  ;;  %v2793_v56 = vpop.f32.mrb[21].mxu1  ;;  %v2864_v16 = vpop.f32.mrb[27].mxu0  ;;  %v2869_v4 = vadd.f32 %v2862_v54, %v6420_v42 }
 0xafd   :  { %v2868_v32 = vadd.f32 %v2793_v56, %v6411_v57  ;;  %v2870_v7 = vadd.f32 %v2864_v16, %v6417_v41 }
 0xafe   :  { %v3937_v22 = vmul.f32 -1.442695, %v2867_v23 }
 0xaff   :  { %v3938_v9 = vmul.f32 -1.442695, %v2868_v32  ;;  %v3939_v34 = vmul.f32 -1.442695, %v2870_v7 }
 0xb00   :  { %5859 = vpow2.f32 %v3937_v22 }
 0xb01   :  { %5861 = vpow2.f32 %v3938_v9 }
 0xb02   :  { %5863 = vpow2.f32 %v3939_v34 }
 0xb03   :  { %5865 = vtanh.f32 %v2869_v4  ;;  %v6972_v4 = vld [vmem:[%s7126_s11] ss:$0 sm:$0xff] }
 0xb0a   :  { %v5860_v17 = vpop.eup %5859 }
 0xb0b   :  { %v5862_v61 = vpop.eup %5861  ;;  %v2874_v30 = vadd.f32 1.0, %v5860_v17 }
 0xb0c   :  { %v2880_v37 = vadd.f32 1.0, %v5862_v61  ;;  %v5864_v6 = vpop.eup %5863  ;;  %v6966_v61 = vld [vmem:[%s7124_s9] ss:$0 sm:$0xff] }
 0xb0d   :  { %5867 = vrcp.f32 %v2874_v30  ;;  %v5866_v51 = vpop.eup %5865  ;;  %v2887_v22 = vadd.f32 1.0, %v5864_v6 }
 0xb0e   :  { %5869 = vrcp.f32 %v2880_v37 }
 0xb0f   :  { %5871 = vrcp.f32 %v2887_v22  ;;  %v7289_v22 = vld [vmem:[#allocation22_spill] sm:$0xff] }
 0xb17   :  { %v5868_v56 = vpop.eup %5867 }
 0xb18   :  { %v5870_v23 = vpop.eup %5869  ;;  %v2891_v32 = vmul.f32 %v5868_v56, %v5866_v51  ;;  %v7284_v56 = vld [vmem:[#allocation17_spill] sm:$0xff] }
 0xb19   :  { %v2890_v9 = vmul.f32 %v5870_v23, %v6820_v55  ;;  %v5872_v7 = vpop.eup %5871  ;;  %v7286_v23 = vld [vmem:[#allocation19_spill] sm:$0xff] }
 0xb1b   :  { %v6916_v16 = vadd.f32 %v2891_v32, %v2890_v9  ;;  %v7287_v32 = vld [vmem:[#allocation20_spill] sm:$0xff]  ;;  %v7290_v9 = vld [vmem:[#allocation23_spill] sm:$0xff] }
 0xb1d   :  { %5873 = vtanh.f32 %v6916_v16 }
 0xb27   :  { %v5874_v17 = vpop.eup %5873 }
 0xb28   :  { %v2894_v34 = vmul.f32 %v5874_v17, %v5872_v7  ;;  %v7291_v7 = vld [vmem:[#allocation24_spill] sm:$0xff]  ;;  %v7292_v17 = vld [vmem:[#allocation25_spill] sm:$0xff] }
 0xb2a   :  { %4598 = vmatmul.mubr.f32.vlgmr.msra.gmra.mrb[22].mxu1 %v2894_v34  ;;  %4633 = vmatmul.mubr.f32.vlgmr.msra.gmra.mrb[28].mxu0 %v2894_v34 }
 0xb2b   :  { %5511 = vmatpush1.bf16.msra.mxu1 %v6074_v25  ;;  %5543 = vmatpush1.bf16.msra.mxu0 %v6059_v8 }
 0xb2c   :  { %5513 = vmatprep.subr.bf16.mxu1 %v6076_v29  ;;  %5545 = vmatprep.subr.bf16.mxu0 %v6061_v12 }
 0xb2d   :  { %3101 = vmatprep.mubr.f32.mxu1 %v7200_v3  ;;  %3172 = vmatprep.mubr.f32.mxu0 %v7200_v3 }
 0xb2f   :  { %5515 = vmatpush1.bf16.msra.mxu1 %v6079_v33  ;;  %5547 = vmatpush1.bf16.msra.mxu0 %v6068_v20 }
 0xb30   :  { %5517 = vmatprep.subr.bf16.mxu1 %v6088_v40  ;;  %5549 = vmatprep.subr.bf16.mxu0 %v6072_v24 }
 0xb33   :  { %5519 = vmatpush1.bf16.msra.mxu1 %v6091_v47  ;;  %5551 = vmatpush1.bf16.msra.mxu0 %v6082_v35 }
 0xb34   :  { %5521 = vmatprep.subr.bf16.mxu1 %v6097_v50  ;;  %5553 = vmatprep.subr.bf16.mxu0 %v6086_v39 }
 0xb37   :  { %5523 = vmatpush1.bf16.msra.mxu1 %v6103_v59  ;;  %5555 = vmatpush1.bf16.msra.mxu0 %v6094_v48 }
 0xb38   :  { %5525 = vmatprep.subr.bf16.mxu1 %v6109_v62  ;;  %5557 = vmatprep.subr.bf16.mxu0 %v6100_v53 }
 0xb3b   :  { %5527 = vmatpush1.bf16.msra.mxu1 %v6115_v10  ;;  %5559 = vmatpush1.bf16.msra.mxu0 %v6106_v60 }
 0xb3c   :  { %5529 = vmatprep.subr.bf16.mxu1 %v6121_v14  ;;  %5561 = vmatprep.subr.bf16.mxu0 %v6112_v2 }
 0xb3f   :  { %5531 = vmatpush1.bf16.msra.mxu1 %v6127_v27  ;;  %5563 = vmatpush1.bf16.msra.mxu0 %v6118_v11 }
 0xb40   :  { %5533 = vmatprep.subr.bf16.mxu1 %v6133_v31  ;;  %5565 = vmatprep.subr.bf16.mxu0 %v6124_v18 }
 0xb43   :  { %5535 = vmatpush1.bf16.msra.mxu1 %v6145_v44  ;;  %5567 = vmatpush1.bf16.msra.mxu0 %v6130_v28 }
 0xb44   :  { %5537 = vmatprep.subr.bf16.mxu1 %v6151_v46  ;;  %5569 = vmatprep.subr.bf16.mxu0 %v6136_v36 }
 0xb47   :  { %5539 = vmatpush1.bf16.msra.mxu1 %v6169_v58  ;;  %5571 = vmatpush1.bf16.msra.mxu0 %v6148_v45 }
 0xb48   :  { %5573 = vmatprep.subr.bf16.mxu1 %v6154_v52  ;;  %5581 = vmatprep.subr.bf16.mxu0 %v6202_v13 }
 0xb4a   :  { %3102 = vmatmul.mubr.f32.vlgmr.msra.gmra.mrb[24].mxu1 %v2894_v34  ;;  %3173 = vmatmul.mubr.f32.vlgmr.msra.gmra.mrb[30].mxu0 %v2894_v34  ;;  %v7293_v34 = vld [vmem:[#allocation26_spill] sm:$0xff] }
 0xb4b   :  { %5575 = vmatpush1.bf16.msra.mxu1 %v6175_v63  ;;  %5583 = vmatpush1.bf16.msra.mxu0 %v7202_v49 }
 0xb4c   :  { %5577 = vmatprep.subr.bf16.mxu1 %v6179_v1  ;;  %5585 = vmatprep.subr.bf16.mxu0 %v7203_v26 }
 0xb4d   :  { %3246 = vmatprep.mubr.f32.mxu1 %v7200_v3  ;;  %3317 = vmatprep.mubr.f32.mxu0 %v7200_v3 }
 0xb4f   :  { %5579 = vmatpush1.bf16.msra.mxu1 %v6189_v5  ;;  %5587 = vmatpush1.bf16.msra.mxu0 %v7204_v0 }
 0xb50   :  { %5588 = vmatprep.subr.bf16.mxu1 %v7201_v43  ;;  %5612 = vmatprep.subr.bf16.mxu0 %v7201_v43 }
 0xbfd   :  { %v2961_v55 = vpop.f32.mrb[22].mxu1  ;;  %v3033_v37 = vpop.f32.mrb[28].mxu0 }
 0xbfe   :  { %v2962_v51 = vadd.f32 %v6966_v61, %v2961_v55  ;;  %v3034_v30 = vadd.f32 %v6972_v4, %v3033_v37  ;;  %v4599_v54 = vpop.f32.mrb[23].mxu1  ;;  %v4634_v6 = vpop.f32.mrb[29].mxu0  ;;  %v7294_v55 = vld [vmem:[#allocation27_spill] sm:$0xff]  ;;  %v7295_v37 = vld [vmem:[#allocation28_spill] sm:$0xff] }
 0xc00   :  { %3940 = vst.msk [vmem:[%s7127_s12 + $0x28] sm:$0xff] %vm182_vm2, %v2962_v51  ;;  %3941 = vmatmul.mubr.msk.f32.vlgmr.msra.gmra.mrb[24].mxu1 %vm404_vm3, %v3034_v30  ;;  %3942 = vmatmul.mubr.msk.f32.vlgmr.msra.gmra.mrb[30].mxu0 %vm404_vm3, %v3034_v30  ;;  %v7296_v51 = vld [vmem:[#allocation9_spill] sm:$0xff]  ;;  %v7297_v30 = vld [vmem:[#allocation8_spill] sm:$0xff] }
 0xc01   :  { %5590 = vmatpush3.bf16.msra.mxu1 %v7215_v15  ;;  %5614 = vmatpush3.bf16.msra.mxu0 %v7216_v38  ;;  %v7285_v38 = vld [vmem:[#allocation18_spill] sm:$0xff] }
 0xc02   :  { %5591 = vmatprep.subr.bf16.mxu1 %v7201_v43  ;;  %5615 = vmatprep.subr.bf16.mxu0 %v7201_v43 }
 0xc03   :  { %4667 = vmatprep.mubr.msk.f32.mxu1 %vm5961_vm0, %v7200_v3  ;;  %4702 = vmatprep.mubr.msk.f32.mxu0 %vm5961_vm0, %v7200_v3 }
 0xc05   :  { %5593 = vmatpush3.bf16.msra.mxu1 %v7267_v19  ;;  %5617 = vmatpush3.bf16.msra.mxu0 %v7268_v21  ;;  %v7288_v21 = vld [vmem:[#allocation21_spill] sm:$0xff] }
 0xc06   :  { %5594 = vmatprep.subr.bf16.mxu1 %v7201_v43  ;;  %5618 = vmatprep.subr.bf16.mxu0 %v7201_v43 }
 0xc09   :  { %5596 = vmatpush3.bf16.msra.mxu1 %v7284_v56  ;;  %5620 = vmatpush3.bf16.msra.mxu0 %v7285_v38  ;;  %v7298_v38 = vld [vmem:[#allocation29_spill] sm:$0xff] }
 0xc0a   :  { %5597 = vmatprep.subr.bf16.mxu1 %v7201_v43  ;;  %5621 = vmatprep.subr.bf16.mxu0 %v7201_v43 }
 0xc0d   :  { %5599 = vmatpush3.bf16.msra.mxu1 %v7286_v23  ;;  %5623 = vmatpush3.bf16.msra.mxu0 %v7287_v32 }
 0xc0e   :  { %5600 = vmatprep.subr.bf16.mxu1 %v7201_v43  ;;  %5624 = vmatprep.subr.bf16.mxu0 %v7201_v43 }
 0xc11   :  { %5602 = vmatpush3.bf16.msra.mxu1 %v7288_v21  ;;  %5626 = vmatpush3.bf16.msra.mxu0 %v7289_v22 }
 0xc12   :  { %5603 = vmatprep.subr.bf16.mxu1 %v7201_v43  ;;  %5627 = vmatprep.subr.bf16.mxu0 %v7201_v43 }
 0xc15   :  { %5605 = vmatpush3.bf16.msra.mxu1 %v7290_v9  ;;  %5629 = vmatpush3.bf16.msra.mxu0 %v7291_v7 }
 0xc16   :  { %5606 = vmatprep.subr.bf16.mxu1 %v7201_v43  ;;  %5630 = vmatprep.subr.bf16.mxu0 %v7201_v43 }
 0xc19   :  { %5608 = vmatpush3.bf16.msra.mxu1 %v7292_v17  ;;  %5632 = vmatpush3.bf16.msra.mxu0 %v7293_v34 }
 0xc1a   :  { %5609 = vmatprep.subr.bf16.mxu1 %v7201_v43  ;;  %5633 = vmatprep.subr.bf16.mxu0 %v7201_v43 }
 0xc1d   :  { %5611 = vmatpush3.bf16.msra.mxu1 %v7294_v55  ;;  %5635 = vmatpush3.bf16.msra.mxu0 %v7295_v37 }
 0xc1e   :  { %5637 = vmatprep.subr.bf16.mxu1 %v7296_v51  ;;  %5669 = vmatprep.subr.bf16.mxu0 %v7297_v30 }
 0xcd3   :  { %v3248_v54 = vpop.f32.mrb[24].mxu1  ;;  %v3319_v6 = vpop.f32.mrb[30].mxu0 }
 0xcd4   :  { %v3324_v32 = vadd.f32 %v3248_v54, %v7298_v38  ;;  %v3250_v22 = vpop.f32.mrb[25].mxu1  ;;  %v3321_v7 = vpop.f32.mrb[31].mxu0  ;;  %v3326_v37 = vadd.f32 %v3319_v6, %v6420_v42 }
 0xcd5   :  { %v3325_v34 = vadd.f32 %v3250_v22, %v6411_v57  ;;  %v3327_v55 = vadd.f32 %v3321_v7, %v6417_v41 }
 0xcd6   :  { %v3943_v17 = vmul.f32 -1.442695, %v3324_v32 }
 0xcd7   :  { %v3944_v9 = vmul.f32 -1.442695, %v3325_v34  ;;  %v3945_v21 = vmul.f32 -1.442695, %v3327_v55 }
 0xcd8   :  { %5875 = vpow2.f32 %v3943_v17 }
 0xcd9   :  { %5877 = vpow2.f32 %v3944_v9 }
 0xcda   :  { %5879 = vpow2.f32 %v3945_v21 }
 0xcdb   :  { %5881 = vtanh.f32 %v3326_v37 }
 0xce2   :  { %v5876_v51 = vpop.eup %5875 }
 0xce3   :  { %v5878_v23 = vpop.eup %5877  ;;  %v3331_v30 = vadd.f32 1.0, %v5876_v51 }
 0xce4   :  { %v3337_v56 = vadd.f32 1.0, %v5878_v23  ;;  %v5880_v54 = vpop.eup %5879 }
 0xce5   :  { %5883 = vrcp.f32 %v3331_v30  ;;  %v5882_v38 = vpop.eup %5881  ;;  %v3344_v17 = vadd.f32 1.0, %v5880_v54 }
 0xce6   :  { %5885 = vrcp.f32 %v3337_v56 }
 0xce7   :  { %5887 = vrcp.f32 %v3344_v17 }
 0xcef   :  { %v5884_v22 = vpop.eup %5883 }
 0xcf0   :  { %v5886_v32 = vpop.eup %5885  ;;  %v3348_v34 = vmul.f32 %v5884_v22, %v5882_v38 }
 0xcf1   :  { %v3347_v9 = vmul.f32 %v5886_v32, %v6916_v16  ;;  %v5888_v55 = vpop.eup %5887 }
 0xcf3   :  { %v7022_v7 = vadd.f32 %v3348_v34, %v3347_v9 }
 0xcf5   :  { %5889 = vtanh.f32 %v7022_v7 }
 0xcff   :  { %v5890_v6 = vpop.eup %5889 }
 0xd00   :  { %v3351_v21 = vmul.f32 %v5890_v6, %v5888_v55 }
 0xd02   :  { %4668 = vmatmul.mubr.f32.vlgmr.msra.gmra.mrb[26].mxu1 %v3351_v21  ;;  %4703 = vmatmul.mubr.f32.vlgmr.msra.gmra.mrb[32].mxu0 %v3351_v21 }
 0xd03   :  { %5639 = vmatpush1.bf16.msra.mxu1 %v6074_v25  ;;  %5671 = vmatpush1.bf16.msra.mxu0 %v6059_v8 }
 0xd04   :  { %5641 = vmatprep.subr.bf16.mxu1 %v6076_v29  ;;  %5673 = vmatprep.subr.bf16.mxu0 %v6061_v12 }
 0xd05   :  { %3558 = vmatprep.mubr.f32.mxu1 %v7200_v3  ;;  %3629 = vmatprep.mubr.f32.mxu0 %v7200_v3 }
 0xd07   :  { %5643 = vmatpush1.bf16.msra.mxu1 %v6079_v33  ;;  %5675 = vmatpush1.bf16.msra.mxu0 %v6068_v20  ;;  %v7299_v33 = vld [vmem:[#allocation17_spill] sm:$0xff] }
 0xd08   :  { %5645 = vmatprep.subr.bf16.mxu1 %v6088_v40  ;;  %5677 = vmatprep.subr.bf16.mxu0 %v6072_v24  ;;  %v7302_v40 = vld [vmem:[#allocation23_spill] sm:$0xff] }
 0xd0b   :  { %5647 = vmatpush1.bf16.msra.mxu1 %v6091_v47  ;;  %5679 = vmatpush1.bf16.msra.mxu0 %v6082_v35  ;;  %v7300_v35 = vld [vmem:[#allocation19_spill] sm:$0xff]  ;;  %v7303_v47 = vld [vmem:[#allocation25_spill] sm:$0xff] }
 0xd0c   :  { %5649 = vmatprep.subr.bf16.mxu1 %v6097_v50  ;;  %5681 = vmatprep.subr.bf16.mxu0 %v6086_v39  ;;  %v7301_v39 = vld [vmem:[#allocation21_spill] sm:$0xff] }
 0xd0f   :  { %5651 = vmatpush1.bf16.msra.mxu1 %v6103_v59  ;;  %5683 = vmatpush1.bf16.msra.mxu0 %v6094_v48  ;;  %v7304_v48 = vld [vmem:[#allocation27_spill] sm:$0xff]  ;;  %v7305_v59 = vld [vmem:[#allocation29_spill] sm:$0xff] }
 0xd10   :  { %5653 = vmatprep.subr.bf16.mxu1 %v6109_v62  ;;  %5685 = vmatprep.subr.bf16.mxu0 %v6100_v53 }
 0xd13   :  { %5655 = vmatpush1.bf16.msra.mxu1 %v6115_v10  ;;  %5687 = vmatpush1.bf16.msra.mxu0 %v6106_v60 }
 0xd14   :  { %5657 = vmatprep.subr.bf16.mxu1 %v6121_v14  ;;  %5689 = vmatprep.subr.bf16.mxu0 %v6112_v2 }
 0xd17   :  { %5659 = vmatpush1.bf16.msra.mxu1 %v6127_v27  ;;  %5691 = vmatpush1.bf16.msra.mxu0 %v6118_v11 }
 0xd18   :  { %5661 = vmatprep.subr.bf16.mxu1 %v6133_v31  ;;  %5693 = vmatprep.subr.bf16.mxu0 %v6124_v18 }
 0xd1b   :  { %5663 = vmatpush1.bf16.msra.mxu1 %v6145_v44  ;;  %5695 = vmatpush1.bf16.msra.mxu0 %v6130_v28 }
 0xd1c   :  { %5665 = vmatprep.subr.bf16.mxu1 %v6151_v46  ;;  %5697 = vmatprep.subr.bf16.mxu0 %v6136_v36 }
 0xd1f   :  { %5667 = vmatpush1.bf16.msra.mxu1 %v6169_v58  ;;  %5699 = vmatpush1.bf16.msra.mxu0 %v6148_v45 }
 0xd20   :  { %5701 = vmatprep.subr.bf16.mxu1 %v6154_v52  ;;  %5709 = vmatprep.subr.bf16.mxu0 %v6202_v13 }
 0xd22   :  { %3559 = vmatmul.mubr.f32.vlgmr.msra.gmra.mrb[28].mxu1 %v3351_v21  ;;  %3630 = vmatmul.mubr.f32.vlgmr.msra.gmra.mrb[34].mxu0 %v3351_v21 }
 0xd23   :  { %5703 = vmatpush1.bf16.msra.mxu1 %v6175_v63  ;;  %5711 = vmatpush1.bf16.msra.mxu0 %v7202_v49 }
 0xd24   :  { %5705 = vmatprep.subr.bf16.mxu1 %v6179_v1  ;;  %5713 = vmatprep.subr.bf16.mxu0 %v7203_v26 }
 0xd25   :  { %3703 = vmatprep.mubr.f32.mxu1 %v7200_v3  ;;  %3774 = vmatprep.mubr.f32.mxu0 %v7200_v3 }
 0xd27   :  { %5707 = vmatpush1.bf16.msra.mxu1 %v6189_v5  ;;  %5715 = vmatpush1.bf16.msra.mxu0 %v7204_v0 }
 0xd28   :  { %5716 = vmatprep.subr.bf16.mxu1 %v7201_v43 }
 0xdd5   :  { %v3418_v8 = vpop.f32.mrb[26].mxu1  ;;  %v3490_v12 = vpop.f32.mrb[32].mxu0 }
 0xdd6   :  { %v3419_v20 = vadd.f32 %v6966_v61, %v3418_v8  ;;  %v3491_v24 = vadd.f32 %v6972_v4, %v3490_v12  ;;  %v4669_v25 = vpop.f32.mrb[27].mxu1  ;;  %v4704_v29 = vpop.f32.mrb[33].mxu0 }
 0xdd8   :  { %3946 = vst.msk [vmem:[%s7127_s12 + $0x30] sm:$0xff] %vm182_vm2, %v3419_v20  ;;  %3947 = vmatmul.mubr.msk.f32.vlgmr.msra.gmra.mrb[28].mxu1 %vm404_vm3, %v3491_v24  ;;  %3948 = vmatmul.mubr.msk.f32.vlgmr.msra.gmra.mrb[34].mxu0 %vm404_vm3, %v3491_v24 }
 0xdd9   :  { %5718 = vmatpush3.bf16.msra.mxu1 %v7215_v15  ;;  %4737 = vmatprep.mubr.msk.f32.mxu1 %vm5961_vm0, %v7200_v3 }
 0xdda   :  { %5719 = vmatprep.subr.bf16.mxu1 %v7201_v43 }
 0xddd   :  { %5721 = vmatpush3.bf16.msra.mxu1 %v7267_v19 }
 0xdde   :  { %5722 = vmatprep.subr.bf16.mxu1 %v7201_v43 }
 0xde1   :  { %5724 = vmatpush3.bf16.msra.mxu1 %v7299_v33 }
 0xde2   :  { %5725 = vmatprep.subr.bf16.mxu1 %v7201_v43 }
 0xde5   :  { %5727 = vmatpush3.bf16.msra.mxu1 %v7300_v35 }
 0xde6   :  { %5728 = vmatprep.subr.bf16.mxu1 %v7201_v43 }
 0xde9   :  { %5730 = vmatpush3.bf16.msra.mxu1 %v7301_v39 }
 0xdea   :  { %5731 = vmatprep.subr.bf16.mxu1 %v7201_v43 }
 0xded   :  { %5733 = vmatpush3.bf16.msra.mxu1 %v7302_v40 }
 0xdee   :  { %5734 = vmatprep.subr.bf16.mxu1 %v7201_v43 }
 0xdf1   :  { %5736 = vmatpush3.bf16.msra.mxu1 %v7303_v47 }
 0xdf2   :  { %5737 = vmatprep.subr.bf16.mxu1 %v7201_v43 }
 0xdf5   :  { %5739 = vmatpush3.bf16.msra.mxu1 %v7304_v48 }
 0xeab   :  { %v3705_v50 = vpop.f32.mrb[28].mxu1  ;;  %v3776_v53 = vpop.f32.mrb[34].mxu0 }
 0xeac   :  { %v3781_v60 = vadd.f32 %v3705_v50, %v7305_v59  ;;  %v3707_v62 = vpop.f32.mrb[29].mxu1  ;;  %v3778_v2 = vpop.f32.mrb[35].mxu0  ;;  %v3783_v28 = vadd.f32 %v3776_v53, %v6420_v42 }
 0xead   :  { %v3782_v10 = vadd.f32 %v3707_v62, %v6411_v57  ;;  %v3784_v18 = vadd.f32 %v3778_v2, %v6417_v41 }
 0xeae   :  { %v3949_v11 = vmul.f32 -1.442695, %v3781_v60 }
 0xeaf   :  { %v3950_v14 = vmul.f32 -1.442695, %v3782_v10  ;;  %v3951_v27 = vmul.f32 -1.442695, %v3784_v18 }
 0xeb0   :  { %5891 = vpow2.f32 %v3949_v11 }
 0xeb1   :  { %5893 = vpow2.f32 %v3950_v14 }
 0xeb2   :  { %5895 = vpow2.f32 %v3951_v27 }
 0xeb3   :  { %5897 = vtanh.f32 %v3783_v28 }
 0xeba   :  { %v5892_v31 = vpop.eup %5891 }
 0xebb   :  { %v5894_v36 = vpop.eup %5893  ;;  %v3788_v44 = vadd.f32 1.0, %v5892_v31 }
 0xebc   :  { %v3794_v45 = vadd.f32 1.0, %v5894_v36  ;;  %v5896_v46 = vpop.eup %5895 }
 0xebd   :  { %5899 = vrcp.f32 %v3788_v44  ;;  %v5898_v52 = vpop.eup %5897  ;;  %v3801_v5 = vadd.f32 1.0, %v5896_v46 }
 0xebe   :  { %5901 = vrcp.f32 %v3794_v45 }
 0xebf   :  { %5903 = vrcp.f32 %v3801_v5 }
 0xec7   :  { %v5900_v58 = vpop.eup %5899 }
 0xec8   :  { %v5902_v63 = vpop.eup %5901  ;;  %v3805_v1 = vmul.f32 %v5900_v58, %v5898_v52 }
 0xec9   :  { %v3804_v13 = vmul.f32 %v5902_v63, %v7022_v7  ;;  %v5904_v57 = vpop.eup %5903 }
 0xecb   :  { %v3806_v41 = vadd.f32 %v3805_v1, %v3804_v13 }
 0xecd   :  { %5905 = vtanh.f32 %v3806_v41 }
 0xed7   :  { %v5906_v42 = vpop.eup %5905 }
 0xed8   :  { %v3808_v3 = vmul.f32 %v5906_v42, %v5904_v57 }
 0xeda   :  { %4738 = vmatmul.mubr.f32.vlgmr.msra.gmra.mrb[30].mxu1 %v3808_v3  ;;  %3881 = vst [vmem:[#allocation5] sm:$0xff] %v3808_v3 }
 0xedb   :  { %5942 = shalt.err (!%p5939_p12)
}
 0xedc   :  { %s5943_s7 = scalar_lea.hbm %s7128_s13, 128 }
 0xedd   :  { %p5944_p13 = scmp.ne.s32.totalorder %s7128_s13, %s5943_s7  ;;  %p5947_p0 = scmp.lt.u32.totalorder %s5943_s7, %s7128_s13 }
 0xedf   :  { %p5949_p1 = pnand %p5947_p0, %p5944_p13 }
 0xee1   :  { %5952 = shalt.err (!%p5949_p1)
}
 0xee2   :  { %3893 = dma.vmem_to_hbm [thread:$0]  %s3891_s14, 128, %s7128_s13, [#allocation4]  }
 0xfad   :  { %v3875_v43 = vpop.f32.mrb[30].mxu1 }
 0xfae   :  { %v3876_v49 = vadd.f32 %v6966_v61, %v3875_v43  ;;  %v4739_v26 = vpop.f32.mrb[31].mxu1 }
 0xfb0   :  { %3952 = vst.msk [vmem:[%s7127_s12 + $0x38] sm:$0xff] %vm182_vm2, %v3876_v49 }
 0xfb1   :  { %5955 = dma.done.wait [#allocation4], 128  }
 0xfb2   :  { %5956 = vsyncadd [#allocation4], 4294967168 }
 0xfb3   :  { %3899 = vsyncpa [#allocation3], 1 }
 0xfb4   :  { %3900 = vsyncpa [#allocation4], 1 }

</bundles_post_ra>
